<compile_context>
chip_gen: v7x
topology: tpu7x:2x2x1
jax: 0.10.0
libtpu: 0.0.40
codegen_flags: <defaults>
</compile_context>

<pallas_src>
import jax
import jax.numpy as jnp
from jax.experimental import pallas as pl
from jax.experimental.pallas import tpu as pltpu

IN_DIM = 28 * 28   # 784
H1_DIM = 128
H2_DIM = 64
OUT_DIM = 10
OUT_PAD = 128      # lane-dense padded output width
TB = 256           # batch tile (multiple of MXU height on v5e/v6e/v7x)


def mlp_kernel(x_ref, w1_ref, b1_ref, w2_ref, b2_ref, w3_ref, b3_ref, o_ref):
    # Layer 1: (TB,784)bf16 @ (784,128)bf16 -> f32, +bias, ReLU (f32), back to bf16 for MXU.
    h1 = jnp.dot(x_ref[...], w1_ref[...], preferred_element_type=jnp.float32)
    h1 = jnp.maximum(h1 + b1_ref[...], 0.0).astype(jnp.bfloat16)
    # Layer 2: (TB,128) @ (128,64)
    h2 = jnp.dot(h1, w2_ref[...], preferred_element_type=jnp.float32)
    h2 = jnp.maximum(h2 + b2_ref[...], 0.0).astype(jnp.bfloat16)
    # Layer 3: (TB,64) @ (64,128 padded), no activation; lane-dense f32 store.
    o = jnp.dot(h2, w3_ref[...], preferred_element_type=jnp.float32) + b3_ref[...]
    o_ref[...] = o.astype(o_ref.dtype)


def simple_nn_forward(x, params, *, tb=TB):
    w1, b1, w2, b2, w3, b3 = params
    B = x.shape[0]
    B_pad = ((B + tb - 1) // tb) * tb
    if B_pad != B:
        x = jnp.pad(x, ((0, B_pad - B), (0, 0)))

    # bf16 matmul inputs, f32 biases / accumulation.
    xb = x.astype(jnp.bfloat16)
    w1b = w1.astype(jnp.bfloat16)
    w2b = w2.astype(jnp.bfloat16)
    w3p = jnp.pad(w3, ((0, 0), (0, OUT_PAD - OUT_DIM))).astype(jnp.bfloat16)
    b1f = b1.astype(jnp.float32)
    b2f = b2.astype(jnp.float32)
    b3p = jnp.pad(b3, ((0, 0), (0, OUT_PAD - OUT_DIM))).astype(jnp.float32)

    grid = (B_pad // tb,)
    flops = 2 * B_pad * (IN_DIM * H1_DIM + H1_DIM * H2_DIM + H2_DIM * OUT_PAD)
    bytes_accessed = (
        B_pad * IN_DIM * 2                                            # x stream (bf16)
        + (IN_DIM * H1_DIM + H1_DIM * H2_DIM + H2_DIM * OUT_PAD) * 2  # weights (bf16)
        + (H1_DIM + H2_DIM + OUT_PAD) * 4                             # biases (f32)
        + B_pad * OUT_PAD * 4                                         # output (f32)
    )

    out = pl.pallas_call(
        mlp_kernel,
        out_shape=jax.ShapeDtypeStruct((B_pad, OUT_PAD), jnp.float32),
        grid=grid,
        in_specs=[
            pl.BlockSpec((tb, IN_DIM), lambda i: (i, 0)),        # x: streamed per tile
            pl.BlockSpec((IN_DIM, H1_DIM), lambda i: (0, 0)),    # w1: VMEM-resident
            pl.BlockSpec((1, H1_DIM), lambda i: (0, 0)),         # b1
            pl.BlockSpec((H1_DIM, H2_DIM), lambda i: (0, 0)),    # w2
            pl.BlockSpec((1, H2_DIM), lambda i: (0, 0)),         # b2
            pl.BlockSpec((H2_DIM, OUT_PAD), lambda i: (0, 0)),   # w3 (lane-padded)
            pl.BlockSpec((1, OUT_PAD), lambda i: (0, 0)),        # b3 (lane-padded)
        ],
        out_specs=pl.BlockSpec((tb, OUT_PAD), lambda i: (i, 0)),
        compiler_params=pltpu.CompilerParams(
            dimension_semantics=("parallel",),
        ),
        cost_estimate=pl.CostEstimate(
            flops=flops, transcendentals=0, bytes_accessed=bytes_accessed),
    )(xb, w1b, b1f, w2b, b2f, w3p, b3p)

    return out[:B, :OUT_DIM]


def init_params(key):
    # Deterministic init mimicking torch.nn.Linear default (uniform +/- 1/sqrt(fan_in)).
    # Weights stored transposed vs. PyTorch, i.e. shape (in, out), so each layer is x @ W + b.
    def linear(key, fan_in, fan_out):
        kw, kb = jax.random.split(key)
        bound = 1.0 / (fan_in ** 0.5)
        w = jax.random.uniform(kw, (fan_in, fan_out), jnp.float32, -bound, bound)
        b = jax.random.uniform(kb, (1, fan_out), jnp.float32, -bound, bound)
        return w, b

    k1, k2, k3 = jax.random.split(key, 3)
    w1, b1 = linear(k1, IN_DIM, H1_DIM)
    w2, b2 = linear(k2, H1_DIM, H2_DIM)
    w3, b3 = linear(k3, H2_DIM, OUT_DIM)
    return (w1, b1, w2, b2, w3, b3)


def reference_forward(x, params):
    # Pure-JAX f32 reference matching the PyTorch module semantics.
    w1, b1, w2, b2, w3, b3 = params
    h1 = jnp.maximum(x @ w1 + b1, 0.0)
    h2 = jnp.maximum(h1 @ w2 + b2, 0.0)
    return h2 @ w3 + b3


if __name__ == "__main__":
    key = jax.random.PRNGKey(0)
    kx, kp = jax.random.split(key)
    B = 8
    x = jax.random.normal(kx, (B, IN_DIM), jnp.float32)
    params = init_params(kp)

    out = simple_nn_forward(x, params)
    out = jax.block_until_ready(out)

    ref = reference_forward(x, params)
    assert out.shape == (B, OUT_DIM), out.shape
    # bf16 matmul inputs with f32 accumulation -> loosened tolerance vs. f32 reference.
    assert jnp.allclose(out, ref, atol=2e-2, rtol=2e-2), float(jnp.max(jnp.abs(out - ref)))
    print("KERNEL_OK")
</pallas_src>

<mosaic_0001>
module attributes {stable_mosaic.version = 11 : i64} {
  func.func @mlp_kernel(%arg0: i32, %arg1: memref<256x784xbf16, #tpu.memory_space<vmem>>, %arg2: memref<784x128xbf16, #tpu.memory_space<vmem>>, %arg3: memref<1x128xf32, #tpu.memory_space<vmem>>, %arg4: memref<128x64xbf16, #tpu.memory_space<vmem>>, %arg5: memref<1x64xf32, #tpu.memory_space<vmem>>, %arg6: memref<64x128xbf16, #tpu.memory_space<vmem>>, %arg7: memref<1x128xf32, #tpu.memory_space<vmem>>, %arg8: memref<256x128xf32, #tpu.memory_space<vmem>>) attributes {dimension_semantics = [#tpu.dimension_semantics<parallel>], iteration_bounds = array<i64: 1>, scalar_prefetch = 0 : i64, scratch_operands = 0 : i64, tpu.core_type = #tpu.core_type<tc>, window_params = [{transform_indices = @transform_0, window_bounds = array<i64: 256, 784>}, {pipeline_mode = #tpu.pipeline_mode<synchronous>, transform_indices = @transform_1, window_bounds = array<i64: 784, 128>}, {pipeline_mode = #tpu.pipeline_mode<synchronous>, transform_indices = @transform_2, window_bounds = array<i64: 1, 128>}, {pipeline_mode = #tpu.pipeline_mode<synchronous>, transform_indices = @transform_3, window_bounds = array<i64: 128, 64>}, {pipeline_mode = #tpu.pipeline_mode<synchronous>, transform_indices = @transform_4, window_bounds = array<i64: 1, 64>}, {pipeline_mode = #tpu.pipeline_mode<synchronous>, transform_indices = @transform_5, window_bounds = array<i64: 64, 128>}, {pipeline_mode = #tpu.pipeline_mode<synchronous>, transform_indices = @transform_6, window_bounds = array<i64: 1, 128>}, {transform_indices = @transform_7, window_bounds = array<i64: 256, 128>}]} {
    %c0 = arith.constant 0 : index
    %c0_0 = arith.constant 0 : index
    %0 = vector.load %arg1[%c0, %c0_0] : memref<256x784xbf16, #tpu.memory_space<vmem>>, vector<256x784xbf16>
    %c0_1 = arith.constant 0 : index
    %c0_2 = arith.constant 0 : index
    %1 = vector.load %arg2[%c0_1, %c0_2] : memref<784x128xbf16, #tpu.memory_space<vmem>>, vector<784x128xbf16>
    %cst = arith.constant dense<0.000000e+00> : vector<256x128xf32>
    %2 = tpu.matmul %0, %1, %cst {dimension_numbers = #tpu.dot_dimension_numbers<[1], [0], [0], [1], [0, 0, 1, 1], [], []>} : vector<256x784xbf16>, vector<784x128xbf16>, vector<256x128xf32> -> vector<256x128xf32>
    %c0_3 = arith.constant 0 : index
    %c0_4 = arith.constant 0 : index
    %3 = vector.load %arg3[%c0_3, %c0_4] : memref<1x128xf32, #tpu.memory_space<vmem>>, vector<1x128xf32>
    %4 = vector.broadcast %3 : vector<1x128xf32> to vector<256x128xf32>
    %5 = arith.addf %2, %4 : vector<256x128xf32>
    %cst_5 = arith.constant 0.000000e+00 : f32
    %6 = vector.broadcast %cst_5 : f32 to vector<256x128xf32>
    %7 = arith.maximumf %5, %6 : vector<256x128xf32>
    %8 = arith.truncf %7 : vector<256x128xf32> to vector<256x128xbf16>
    %c0_6 = arith.constant 0 : index
    %c0_7 = arith.constant 0 : index
    %9 = vector.load %arg4[%c0_6, %c0_7] : memref<128x64xbf16, #tpu.memory_space<vmem>>, vector<128x64xbf16>
    %cst_8 = arith.constant dense<0.000000e+00> : vector<256x64xf32>
    %10 = tpu.matmul %8, %9, %cst_8 {dimension_numbers = #tpu.dot_dimension_numbers<[1], [0], [0], [1], [0, 0, 1, 1], [], []>} : vector<256x128xbf16>, vector<128x64xbf16>, vector<256x64xf32> -> vector<256x64xf32>
    %c0_9 = arith.constant 0 : index
    %c0_10 = arith.constant 0 : index
    %11 = vector.load %arg5[%c0_9, %c0_10] : memref<1x64xf32, #tpu.memory_space<vmem>>, vector<1x64xf32>
    %12 = vector.broadcast %11 : vector<1x64xf32> to vector<256x64xf32>
    %13 = arith.addf %10, %12 : vector<256x64xf32>
    %cst_11 = arith.constant 0.000000e+00 : f32
    %14 = vector.broadcast %cst_11 : f32 to vector<256x64xf32>
    %15 = arith.maximumf %13, %14 : vector<256x64xf32>
    %16 = arith.truncf %15 : vector<256x64xf32> to vector<256x64xbf16>
    %c0_12 = arith.constant 0 : index
    %c0_13 = arith.constant 0 : index
    %17 = vector.load %arg6[%c0_12, %c0_13] : memref<64x128xbf16, #tpu.memory_space<vmem>>, vector<64x128xbf16>
    %cst_14 = arith.constant dense<0.000000e+00> : vector<256x128xf32>
    %18 = tpu.matmul %16, %17, %cst_14 {dimension_numbers = #tpu.dot_dimension_numbers<[1], [0], [0], [1], [0, 0, 1, 1], [], []>} : vector<256x64xbf16>, vector<64x128xbf16>, vector<256x128xf32> -> vector<256x128xf32>
    %c0_15 = arith.constant 0 : index
    %c0_16 = arith.constant 0 : index
    %19 = vector.load %arg7[%c0_15, %c0_16] : memref<1x128xf32, #tpu.memory_space<vmem>>, vector<1x128xf32>
    %20 = vector.broadcast %19 : vector<1x128xf32> to vector<256x128xf32>
    %21 = arith.addf %18, %20 : vector<256x128xf32>
    %c0_17 = arith.constant 0 : index
    %c0_18 = arith.constant 0 : index
    %22 = vector.load %arg8[%c0_17, %c0_18] : memref<256x128xf32, #tpu.memory_space<vmem>>, vector<256x128xf32>
    tpu.vector_store %arg8[%c0_17, %c0_18], %21 {strides = array<i32>} : memref<256x128xf32, #tpu.memory_space<vmem>>, vector<256x128xf32>,
    return
  }
  func.func @transform_0(%arg0: i32) -> (i32, i32) {
    %c0_i32 = arith.constant 0 : i32
    %c0_i32_0 = arith.constant 0 : i32
    return %arg0, %c0_i32 : i32, i32
  }
  func.func @transform_1(%arg0: i32) -> (i32, i32) {
    %c0_i32 = arith.constant 0 : i32
    %c0_i32_0 = arith.constant 0 : i32
    %c0_i32_1 = arith.constant 0 : i32
    return %c0_i32, %c0_i32_0 : i32, i32
  }
  func.func @transform_2(%arg0: i32) -> (i32, i32) {
    %c0_i32 = arith.constant 0 : i32
    %c0_i32_0 = arith.constant 0 : i32
    %c0_i32_1 = arith.constant 0 : i32
    return %c0_i32, %c0_i32_0 : i32, i32
  }
  func.func @transform_3(%arg0: i32) -> (i32, i32) {
    %c0_i32 = arith.constant 0 : i32
    %c0_i32_0 = arith.constant 0 : i32
    %c0_i32_1 = arith.constant 0 : i32
    return %c0_i32, %c0_i32_0 : i32, i32
  }
  func.func @transform_4(%arg0: i32) -> (i32, i32) {
    %c0_i32 = arith.constant 0 : i32
    %c0_i32_0 = arith.constant 0 : i32
    %c0_i32_1 = arith.constant 0 : i32
    return %c0_i32, %c0_i32_0 : i32, i32
  }
  func.func @transform_5(%arg0: i32) -> (i32, i32) {
    %c0_i32 = arith.constant 0 : i32
    %c0_i32_0 = arith.constant 0 : i32
    %c0_i32_1 = arith.constant 0 : i32
    return %c0_i32, %c0_i32_0 : i32, i32
  }
  func.func @transform_6(%arg0: i32) -> (i32, i32) {
    %c0_i32 = arith.constant 0 : i32
    %c0_i32_0 = arith.constant 0 : i32
    %c0_i32_1 = arith.constant 0 : i32
    return %c0_i32, %c0_i32_0 : i32, i32
  }
  func.func @transform_7(%arg0: i32) -> (i32, i32) {
    %c0_i32 = arith.constant 0 : i32
    %c0_i32_0 = arith.constant 0 : i32
    return %arg0, %c0_i32 : i32, i32
  }
}

</mosaic_0001>

<bundles_post_ra>
// kernel: tpu_custom_call.1
= control target key start
LH: loop header
LB: loop body
LE: loop exit
PB: predicated region body
PF: predicated region fallthrough
CT: control target
= control target key end

     0   :  { %s4378_s0 = inlined_call_operand.vmem [shape: bf16[256,784], index: 0, kind: input, shape index: {}]   ;;  %s4379_s1 = inlined_call_operand.vmem [shape: bf16[784,128], index: 1, kind: input, shape index: {}]   ;;  %s4380_s2 = inlined_call_operand.vmem [shape: f32[1,128], index: 2, kind: input, shape index: {}]   ;;  %s4381_s3 = inlined_call_operand.vmem [shape: bf16[128,64], index: 3, kind: input, shape index: {}]   ;;  %s4382_s4 = inlined_call_operand.vmem [shape: f32[1,64], index: 4, kind: input, shape index: {}]   ;;  %s4383_s5 = inlined_call_operand.vmem [shape: bf16[64,128], index: 5, kind: input, shape index: {}]   ;;  %s4384_s6 = inlined_call_operand.vmem [shape: f32[1,128], index: 6, kind: input, shape index: {}]   ;;  %s4385_s7 = inlined_call_operand.hbm [shape: f32[256,128], index: 7, kind: output, shape index: {}]  }
   0x1   :  { %v3179_v0 = vld [vmem:[%s4379_s1 + $0x40] sm:$0xff]   ;;  %v3181_v2 = vld [vmem:[%s4379_s1 + $0x48] sm:$0xff]   ;;  %v3183_v4 = vld [vmem:[%s4379_s1 + $0x50] sm:$0xff]  }
   0x2   :  { %v3180_v1 = vld [vmem:[%s4379_s1] sm:$0xff]   ;;  %2641 = vmatprep.subr.bf16.mxu0 %v3179_v0  ;;  %3160 = vmatprep.subr.bf16.mxu1 %v3179_v0  ;;  %v3182_v3 = vld [vmem:[%s4379_s1 + $0x8] sm:$0xff]   ;;  %v3184_v5 = vld [vmem:[%s4379_s1 + $0x10] sm:$0xff]  }
   0x3   :  { %2642 = vmatpush3.bf16.msra.mxu0 %v3180_v1  ;;  %3168 = vmatpush3.bf16.msra.mxu1 %v3180_v1  ;;  %v3185_v6 = vld [vmem:[%s4379_s1 + $0x58] sm:$0xff]   ;;  %v3187_v8 = vld [vmem:[%s4379_s1 + $0x60] sm:$0xff]   ;;  %v3189_v10 = vld [vmem:[%s4379_s1 + $0x68] sm:$0xff]  }
   0x4   :  { %2643 = vmatprep.subr.bf16.mxu0 %v3181_v2  ;;  %3161 = vmatprep.subr.bf16.mxu1 %v3181_v2  ;;  %v3186_v7 = vld [vmem:[%s4379_s1 + $0x18] sm:$0xff]   ;;  %v3188_v9 = vld [vmem:[%s4379_s1 + $0x20] sm:$0xff]   ;;  %v3190_v13 = vld [vmem:[%s4379_s1 + $0x28] sm:$0xff]  }
   0x5   :  { %v3197_v11 = vld [vmem:[%s4378_s0 + $0x4] ss:$28 sps:$4 sm:$0xff]   ;;  %v3191_v14 = vld [vmem:[%s4379_s1 + $0x70] sm:$0xff]   ;;  %v3193_v16 = vld [vmem:[%s4379_s1 + $0x78] sm:$0xff]  }
   0x6   :  { %v3200_v12 = vld [vmem:[%s4378_s0 + $0x2a4] ss:$28 sps:$4 sm:$0xff]   ;;  %1196 = vmatprep.mubr.bf16.mxu0 %v3197_v11  ;;  %v3192_v15 = vld [vmem:[%s4379_s1 + $0x30] sm:$0xff]   ;;  %v3194_v17 = vld [vmem:[%s4379_s1 + $0x38] sm:$0xff]  }
   0x7   :  { %2644 = vmatpush3.bf16.msra.mxu0 %v3182_v3  ;;  %3169 = vmatpush3.bf16.msra.mxu1 %v3182_v3  ;;  %v3201_v18 = vld [vmem:[%s4379_s1 + $0xc0] sm:$0xff]   ;;  %v3205_v24 = vld [vmem:[%s4379_s1 + $0xc8] sm:$0xff]   ;;  %v3207_v25 = vld [vmem:[%s4378_s0 + $0x3c] ss:$28 sps:$4 sm:$0xff]  }
   0x8   :  { %2645 = vmatprep.subr.bf16.mxu0 %v3183_v4  ;;  %3162 = vmatprep.subr.bf16.mxu1 %v3183_v4  ;;  %v3195_v19 = vld [vmem:[%s4378_s0] ss:$28 sps:$4 sm:$0xff]   ;;  %v3216_v27 = vld [vmem:[%s4379_s1 + $0x148] sm:$0xff]   ;;  %v3211_v30 = vld [vmem:[%s4378_s0 + $0x38] ss:$28 sps:$4 sm:$0xff]  }
   0x9   :  { %1292 = vmatprep.mubr.bf16.mxu1 %v3200_v12  ;;  %v3198_v20 = vld [vmem:[%s4378_s0 + $0x2a0] ss:$28 sps:$4 sm:$0xff]   ;;  %v3206_v28 = vld [vmem:[%s4379_s1 + $0x88] sm:$0xff]   ;;  %v3212_v31 = vld [vmem:[%s4378_s0 + $0x2d8] ss:$28 sps:$4 sm:$0xff]  }
   0xa   :  { %v3202_v21 = vld [vmem:[%s4379_s1 + $0x140] sm:$0xff]   ;;  %v3209_v26 = vld [vmem:[%s4378_s0 + $0x2dc] ss:$28 sps:$4 sm:$0xff]   ;;  %v3218_v29 = vld [vmem:[%s4379_s1 + $0x108] sm:$0xff]  }
   0xb   :  { %2646 = vmatpush3.bf16.msra.mxu0 %v3184_v5  ;;  %3170 = vmatpush3.bf16.msra.mxu1 %v3184_v5  ;;  %v3203_v22 = vld [vmem:[%s4379_s1 + $0x80] sm:$0xff]   ;;  %v3213_v32 = vld [vmem:[%s4379_s1 + $0xd0] sm:$0xff]   ;;  %v3215_v34 = vld [vmem:[%s4379_s1 + $0xd8] sm:$0xff]  }
   0xc   :  { %2647 = vmatprep.subr.bf16.mxu0 %v3185_v6  ;;  %3163 = vmatprep.subr.bf16.mxu1 %v3185_v6  ;;  %v3204_v23 = vld [vmem:[%s4379_s1 + $0x100] sm:$0xff]   ;;  %v3214_v33 = vld [vmem:[%s4379_s1 + $0x90] sm:$0xff]   ;;  %v3217_v37 = vld [vmem:[%s4379_s1 + $0x98] sm:$0xff]  }
   0xd   :  { %v3219_v35 = vld [vmem:[%s4378_s0 + $0x74] ss:$28 sps:$4 sm:$0xff]   ;;  %v3225_v38 = vld [vmem:[%s4379_s1 + $0xe0] sm:$0xff]   ;;  %v3227_v43 = vld [vmem:[%s4379_s1 + $0xe8] sm:$0xff]  }
   0xe   :  { %v3221_v36 = vld [vmem:[%s4378_s0 + $0x314] ss:$28 sps:$4 sm:$0xff]   ;;  %v3226_v42 = vld [vmem:[%s4379_s1 + $0xa0] sm:$0xff]   ;;  %v3229_v45 = vld [vmem:[%s4378_s0 + $0xac] ss:$28 sps:$4 sm:$0xff]  }
   0xf   :  { %2648 = vmatpush3.bf16.msra.mxu0 %v3186_v7  ;;  %3171 = vmatpush3.bf16.msra.mxu1 %v3186_v7  ;;  %v3223_v39 = vld [vmem:[%s4378_s0 + $0x70] ss:$28 sps:$4 sm:$0xff]   ;;  %v3233_v48 = vld [vmem:[%s4378_s0 + $0xa8] ss:$28 sps:$4 sm:$0xff]   ;;  %v3248_v52 = vld [vmem:[%s4379_s1 + $0x158] sm:$0xff]  }
  0x10   :  { %2649 = vmatprep.subr.bf16.mxu0 %v3187_v8  ;;  %3164 = vmatprep.subr.bf16.mxu1 %v3187_v8  ;;  %v3224_v40 = vld [vmem:[%s4378_s0 + $0x310] ss:$28 sps:$4 sm:$0xff]   ;;  %v3234_v49 = vld [vmem:[%s4378_s0 + $0x348] ss:$28 sps:$4 sm:$0xff]   ;;  %v3249_v53 = vld [vmem:[%s4379_s1 + $0x118] sm:$0xff]  }
  0x11   :  { %v3236_v41 = vld [vmem:[%s4379_s1 + $0x150] sm:$0xff]   ;;  %v3231_v46 = vld [vmem:[%s4378_s0 + $0x34c] ss:$28 sps:$4 sm:$0xff]   ;;  %v3241_v54 = vld [vmem:[%s4378_s0 + $0xe4] ss:$28 sps:$4 sm:$0xff]  }
  0x12   :  { %v3238_v44 = vld [vmem:[%s4379_s1 + $0x110] sm:$0xff]   ;;  %v3228_v47 = vld [vmem:[%s4379_s1 + $0xa8] sm:$0xff]   ;;  %v3239_v55 = vld [vmem:[%s4379_s1 + $0xf8] sm:$0xff]  }
  0x13   :  { %2650 = vmatpush3.bf16.msra.mxu0 %v3188_v9  ;;  %3172 = vmatpush3.bf16.msra.mxu1 %v3188_v9  ;;  %v3235_v50 = vld [vmem:[%s4379_s1 + $0xf0] sm:$0xff]   ;;  %v3245_v56 = vld [vmem:[%s4378_s0 + $0xc] ss:$28 sps:$4 sm:$0xff]   ;;  %v3240_v57 = vld [vmem:[%s4379_s1 + $0xb8] sm:$0xff]  }
  0x14   :  { %2651 = vmatprep.subr.bf16.mxu0 %v3189_v10  ;;  %3165 = vmatprep.subr.bf16.mxu1 %v3189_v10  ;;  %v3237_v51 = vld [vmem:[%s4379_s1 + $0xb0] sm:$0xff]   ;;  %v3247_v58 = vld [vmem:[%s4379_s1 + $0x180] sm:$0xff]   ;;  %v3250_v63 = vld [vmem:[%s4378_s0 + $0x11c] ss:$28 sps:$4 sm:$0xff]  }
  0x15   :  { %v3243_v59 = vld [vmem:[%s4378_s0 + $0x8] ss:$28 sps:$4 sm:$0xff]   ;;  %v3246_v62 = vld [vmem:[%s4378_s0 + $0xe0] ss:$28 sps:$4 sm:$0xff]   ;;  %v3254_v3 = vld [vmem:[%s4378_s0 + $0x118] ss:$28 sps:$4 sm:$0xff]  }
  0x16   :  { %v3262_v60 = vld [vmem:[%s4379_s1 + $0x160] sm:$0xff]   ;;  %v3270_v1 = vld [vmem:[%s4379_s1 + $0x168] sm:$0xff]   ;;  %v3256_v5 = vld [vmem:[%s4378_s0 + $0x154] ss:$28 sps:$4 sm:$0xff]  }
  0x17   :  { %2652 = vmatpush3.bf16.msra.mxu0 %v3190_v13  ;;  %3173 = vmatpush3.bf16.msra.mxu1 %v3190_v13  ;;  %v3263_v61 = vld [vmem:[%s4379_s1 + $0x120] sm:$0xff]   ;;  %v3271_v2 = vld [vmem:[%s4379_s1 + $0x128] sm:$0xff]   ;;  %v3258_v6 = vld [vmem:[%s4378_s0 + $0x7c] ss:$28 sps:$4 sm:$0xff]  }
  0x18   :  { %2653 = vmatprep.subr.bf16.mxu0 %v3191_v14  ;;  %3166 = vmatprep.subr.bf16.mxu1 %v3191_v14  ;;  %v3252_v0 = vld [vmem:[%s4378_s0 + $0x44] ss:$28 sps:$4 sm:$0xff]   ;;  %v3284_v7 = vld [vmem:[%s4379_s1 + $0x170] sm:$0xff]   ;;  %v3264_v11 = vld [vmem:[%s4378_s0 + $0x18c] ss:$28 sps:$4 sm:$0xff]  }
  0x19   :  { %v3255_v4 = vld [vmem:[%s4378_s0 + $0x40] ss:$28 sps:$4 sm:$0xff]   ;;  %v3285_v8 = vld [vmem:[%s4379_s1 + $0x130] sm:$0xff]  }
  0x1a   :  { %v3260_v9 = vld [vmem:[%s4378_s0 + $0x150] ss:$28 sps:$4 sm:$0xff]   ;;  %v3261_v10 = vld [vmem:[%s4378_s0 + $0x78] ss:$28 sps:$4 sm:$0xff]  }
  0x1b   :  { %2654 = vmatpush3.bf16.msra.mxu0 %v3192_v15  ;;  %3174 = vmatpush3.bf16.msra.mxu1 %v3192_v15  ;;  %v3292_v12 = vld [vmem:[%s4379_s1 + $0x178] sm:$0xff]   ;;  %v3266_v14 = vld [vmem:[%s4378_s0 + $0xb4] ss:$28 sps:$4 sm:$0xff]   ;;  %v3268_v15 = vld [vmem:[%s4378_s0 + $0x188] ss:$28 sps:$4 sm:$0xff]  }
  0x1c   :  { %2655 = vmatprep.subr.bf16.mxu0 %v3193_v16  ;;  %3167 = vmatprep.subr.bf16.mxu1 %v3193_v16  ;;  %v3293_v13 = vld [vmem:[%s4379_s1 + $0x138] sm:$0xff]   ;;  %v3269_v16 = vld [vmem:[%s4378_s0 + $0xb0] ss:$28 sps:$4 sm:$0xff]  }
  0x1f   :  { %2656 = vmatpush3.bf16.msra.mxu0 %v3194_v17  ;;  %3175 = vmatpush3.bf16.msra.mxu1 %v3194_v17  ;;  %v3272_v17 = vld [vmem:[%s4378_s0 + $0x1c4] ss:$28 sps:$4 sm:$0xff]  }
  0x20   :  { %2753 = vmatprep.subr.bf16.mxu1 %v3201_v18  ;;  %2865 = vmatprep.subr.bf16.mxu0 %v3202_v21  ;;  %v3274_v18 = vld [vmem:[%s4378_s0 + $0xec] ss:$28 sps:$4 sm:$0xff]   ;;  %v3278_v21 = vld [vmem:[%s4378_s0 + $0x1fc] ss:$28 sps:$4 sm:$0xff]  }
  0x22   :  { %1197 = vmatmul.mubr.bf16.vlgmr.msra.gmra.mrb[0].mxu0 %v3195_v19  ;;  %1293 = vmatmul.mubr.bf16.vlgmr.msra.gmra.mrb[0].mxu1 %v3198_v20  ;;  %v3276_v19 = vld [vmem:[%s4378_s0 + $0x1c0] ss:$28 sps:$4 sm:$0xff]   ;;  %v3277_v20 = vld [vmem:[%s4378_s0 + $0xe8] ss:$28 sps:$4 sm:$0xff]  }
  0x23   :  { %2754 = vmatpush3.bf16.msra.mxu1 %v3203_v22  ;;  %2866 = vmatpush3.bf16.msra.mxu0 %v3204_v23  ;;  %v3280_v22 = vld [vmem:[%s4378_s0 + $0x124] ss:$28 sps:$4 sm:$0xff]   ;;  %v3282_v23 = vld [vmem:[%s4378_s0 + $0x1f8] ss:$28 sps:$4 sm:$0xff]  }
  0x24   :  { %2755 = vmatprep.subr.bf16.mxu1 %v3205_v24  ;;  %1204 = vmatprep.mubr.bf16.mxu0 %v3207_v25  ;;  %v3283_v24 = vld [vmem:[%s4378_s0 + $0x120] ss:$28 sps:$4 sm:$0xff]   ;;  %v3286_v25 = vld [vmem:[%s4378_s0 + $0x234] ss:$28 sps:$4 sm:$0xff]  }
  0x25   :  { %1300 = vmatprep.mubr.bf16.mxu1 %v3209_v26  ;;  %2867 = vmatprep.subr.bf16.mxu0 %v3216_v27  ;;  %v3288_v26 = vld [vmem:[%s4378_s0 + $0x15c] ss:$28 sps:$4 sm:$0xff]   ;;  %v3290_v27 = vld [vmem:[%s4378_s0 + $0x230] ss:$28 sps:$4 sm:$0xff]  }
  0x27   :  { %2756 = vmatpush3.bf16.msra.mxu1 %v3206_v28  ;;  %2868 = vmatpush3.bf16.msra.mxu0 %v3218_v29  ;;  %v3291_v28 = vld [vmem:[%s4378_s0 + $0x158] ss:$28 sps:$4 sm:$0xff]   ;;  %v3294_v29 = vld [vmem:[%s4378_s0 + $0x26c] ss:$28 sps:$4 sm:$0xff]  }
  0x28   :  { %2757 = vmatprep.subr.bf16.mxu1 %v3213_v32  ;;  %2869 = vmatprep.subr.bf16.mxu0 %v3236_v41  ;;  %v3299_v32 = vld [vmem:[%s4378_s0 + $0x190] ss:$28 sps:$4 sm:$0xff]   ;;  %v3312_v41 = vld [vmem:[%s4378_s0 + $0x23c] ss:$28 sps:$4 sm:$0xff]  }
  0x2a   :  { %1205 = vmatmul.mubr.bf16.gmra.mrb[4].mxu0 %v3211_v30  ;;  %1301 = vmatmul.mubr.bf16.gmra.mrb[4].mxu1 %v3212_v31  ;;  %v3296_v30 = vld [vmem:[%s4378_s0 + $0x194] ss:$28 sps:$4 sm:$0xff]   ;;  %v3298_v31 = vld [vmem:[%s4378_s0 + $0x268] ss:$28 sps:$4 sm:$0xff]  }
  0x2b   :  { %2758 = vmatpush3.bf16.msra.mxu1 %v3214_v33  ;;  %1212 = vmatprep.mubr.bf16.mxu0 %v3219_v35  ;;  %v3300_v33 = vld [vmem:[%s4378_s0 + $0x1cc] ss:$28 sps:$4 sm:$0xff]  }
  0x2c   :  { %2759 = vmatprep.subr.bf16.mxu1 %v3215_v34  ;;  %1308 = vmatprep.mubr.bf16.mxu1 %v3221_v36  ;;  %v3304_v34 = vld [vmem:[%s4378_s0 + $0x14] ss:$28 sps:$4 sm:$0xff]   ;;  %v3305_v36 = vld [vmem:[%s4378_s0 + $0x1c8] ss:$28 sps:$4 sm:$0xff]  }
  0x2d   :  { %2870 = vmatpush3.bf16.msra.mxu0 %v3238_v44  ;;  %v3302_v35 = vld [vmem:[%s4378_s0 + $0x10] ss:$28 sps:$4 sm:$0xff]  }
  0x2e   :  { %2871 = vmatprep.subr.bf16.mxu0 %v3248_v52 }
  0x2f   :  { %2760 = vmatpush3.bf16.msra.mxu1 %v3217_v37  ;;  %v3306_v37 = vld [vmem:[%s4378_s0 + $0x204] ss:$28 sps:$4 sm:$0xff]  }
  0x30   :  { %2761 = vmatprep.subr.bf16.mxu1 %v3225_v38  ;;  %v3308_v38 = vld [vmem:[%s4378_s0 + $0x4c] ss:$28 sps:$4 sm:$0xff]  }
  0x31   :  { %2872 = vmatpush3.bf16.msra.mxu0 %v3249_v53 }
  0x32   :  { %1213 = vmatmul.mubr.bf16.gmra.mrb[8].mxu0 %v3223_v39  ;;  %1309 = vmatmul.mubr.bf16.gmra.mrb[8].mxu1 %v3224_v40  ;;  %v3310_v39 = vld [vmem:[%s4378_s0 + $0x200] ss:$28 sps:$4 sm:$0xff]   ;;  %v3311_v40 = vld [vmem:[%s4378_s0 + $0x48] ss:$28 sps:$4 sm:$0xff]  }
  0x33   :  { %2762 = vmatpush3.bf16.msra.mxu1 %v3226_v42  ;;  %1220 = vmatprep.mubr.bf16.mxu0 %v3229_v45  ;;  %v3314_v42 = vld [vmem:[%s4378_s0 + $0x84] ss:$28 sps:$4 sm:$0xff]  }
  0x34   :  { %2763 = vmatprep.subr.bf16.mxu1 %v3227_v43  ;;  %1316 = vmatprep.mubr.bf16.mxu1 %v3231_v46 }
  0x35   :  { %2873 = vmatprep.subr.bf16.mxu0 %v3262_v60 }
  0x36   :  { %2874 = vmatpush3.bf16.msra.mxu0 %v3263_v61 }
  0x37   :  { %2764 = vmatpush3.bf16.msra.mxu1 %v3228_v47  ;;  %2875 = vmatprep.subr.bf16.mxu0 %v3270_v1 }
  0x38   :  { %2765 = vmatprep.subr.bf16.mxu1 %v3235_v50 }
  0x3a   :  { %1221 = vmatmul.mubr.bf16.gmra.mrb[12].mxu0 %v3233_v48  ;;  %1317 = vmatmul.mubr.bf16.gmra.mrb[12].mxu1 %v3234_v49 }
  0x3b   :  { %2766 = vmatpush3.bf16.msra.mxu1 %v3237_v51  ;;  %1228 = vmatprep.mubr.bf16.mxu0 %v3241_v54 }
  0x3c   :  { %2767 = vmatprep.subr.bf16.mxu1 %v3239_v55  ;;  %1357 = vmatprep.mubr.bf16.mxu1 %v3245_v56 }
  0x3d   :  { %2876 = vmatpush3.bf16.msra.mxu0 %v3271_v2 }
  0x3e   :  { %2877 = vmatprep.subr.bf16.mxu0 %v3284_v7 }
  0x3f   :  { %2768 = vmatpush3.bf16.msra.mxu1 %v3240_v57 }
  0x40   :  { %3038 = vmatprep.subr.bf16.mxu1 %v3247_v58 }
  0x41   :  { %2878 = vmatpush3.bf16.msra.mxu0 %v3285_v8 }
  0x42   :  { %1229 = vmatmul.mubr.bf16.gmra.mrb[16].mxu0 %v3246_v62  ;;  %1358 = vmatmul.mubr.bf16.vlgmr.msra.gmra.mrb[16].mxu1 %v3243_v59 }
  0x43   :  { %3039 = vmatpush3.bf16.msra.mxu1 %v3247_v58  ;;  %1236 = vmatprep.mubr.bf16.mxu0 %v3250_v63 }
  0x44   :  { %1365 = vmatprep.mubr.bf16.mxu1 %v3252_v0  ;;  %2879 = vmatprep.subr.bf16.mxu0 %v3292_v12 }
  0x45   :  { %2880 = vmatpush3.bf16.msra.mxu0 %v3293_v13 }
  0x4a   :  { %1237 = vmatmul.mubr.bf16.gmra.mrb[20].mxu0 %v3254_v3  ;;  %1366 = vmatmul.mubr.bf16.gmra.mrb[20].mxu1 %v3255_v4 }
  0x4b   :  { %1244 = vmatprep.mubr.bf16.mxu0 %v3256_v5  ;;  %1373 = vmatprep.mubr.bf16.mxu1 %v3258_v6 }
  0x52   :  { %1245 = vmatmul.mubr.bf16.gmra.mrb[24].mxu0 %v3260_v9  ;;  %1374 = vmatmul.mubr.bf16.gmra.mrb[24].mxu1 %v3261_v10 }
  0x53   :  { %1252 = vmatprep.mubr.bf16.mxu0 %v3264_v11  ;;  %1381 = vmatprep.mubr.bf16.mxu1 %v3266_v14 }
  0x5a   :  { %1253 = vmatmul.mubr.bf16.gmra.mrb[28].mxu0 %v3268_v15  ;;  %1382 = vmatmul.mubr.bf16.gmra.mrb[28].mxu1 %v3269_v16 }
  0x5b   :  { %1260 = vmatprep.mubr.bf16.mxu0 %v3272_v17  ;;  %1389 = vmatprep.mubr.bf16.mxu1 %v3274_v18 }
  0x62   :  { %1261 = vmatmul.mubr.bf16.gmra.mrb[32].mxu0 %v3276_v19  ;;  %1390 = vmatmul.mubr.bf16.gmra.mrb[32].mxu1 %v3277_v20 }
  0x63   :  { %1268 = vmatprep.mubr.bf16.mxu0 %v3278_v21  ;;  %1397 = vmatprep.mubr.bf16.mxu1 %v3280_v22 }
  0x6a   :  { %1269 = vmatmul.mubr.bf16.gmra.mrb[36].mxu0 %v3282_v23  ;;  %1398 = vmatmul.mubr.bf16.gmra.mrb[36].mxu1 %v3283_v24 }
  0x6b   :  { %1276 = vmatprep.mubr.bf16.mxu0 %v3286_v25  ;;  %1405 = vmatprep.mubr.bf16.mxu1 %v3288_v26 }
  0x72   :  { %1277 = vmatmul.mubr.bf16.gmra.mrb[40].mxu0 %v3290_v27  ;;  %1406 = vmatmul.mubr.bf16.gmra.mrb[40].mxu1 %v3291_v28 }
  0x73   :  { %1284 = vmatprep.mubr.bf16.mxu0 %v3294_v29  ;;  %1413 = vmatprep.mubr.bf16.mxu1 %v3296_v30 }
  0x7a   :  { %1285 = vmatmul.mubr.bf16.gmra.mrb[44].mxu0 %v3298_v31  ;;  %1414 = vmatmul.mubr.bf16.gmra.mrb[44].mxu1 %v3299_v32 }
  0x7b   :  { %1421 = vmatprep.mubr.bf16.mxu1 %v3300_v33  ;;  %1518 = vmatprep.mubr.bf16.mxu0 %v3304_v34 }
  0x82   :  { %1422 = vmatmul.mubr.bf16.gmra.mrb[48].mxu1 %v3305_v36  ;;  %1519 = vmatmul.mubr.bf16.vlgmr.msra.gmra.mrb[48].mxu0 %v3302_v35 }
  0x83   :  { %1429 = vmatprep.mubr.bf16.mxu1 %v3306_v37  ;;  %1526 = vmatprep.mubr.bf16.mxu0 %v3308_v38 }
  0x84   :  { %12 = vsyncpa [#allocation3], 0  ;;  %v3316_v43 = vld [vmem:[%s4378_s0 + $0x238] ss:$28 sps:$4 sm:$0xff]   ;;  %v3317_v44 = vld [vmem:[%s4378_s0 + $0x80] ss:$28 sps:$4 sm:$0xff]  }
  0x85   :  { %v3318_v45 = vld [vmem:[%s4378_s0 + $0x274] ss:$28 sps:$4 sm:$0xff]   ;;  %v3320_v46 = vld [vmem:[%s4378_s0 + $0xbc] ss:$28 sps:$4 sm:$0xff]   ;;  %v3324_v49 = vld [vmem:[%s4378_s0 + $0x2ac] ss:$28 sps:$4 sm:$0xff]  }
  0x86   :  { %v3322_v47 = vld [vmem:[%s4378_s0 + $0x270] ss:$28 sps:$4 sm:$0xff]   ;;  %v3323_v48 = vld [vmem:[%s4378_s0 + $0xb8] ss:$28 sps:$4 sm:$0xff]   ;;  %v3328_v51 = vld [vmem:[%s4378_s0 + $0x2a8] ss:$28 sps:$4 sm:$0xff]  }
  0x87   :  { %v3326_v50 = vld [vmem:[%s4378_s0 + $0xf4] ss:$28 sps:$4 sm:$0xff]   ;;  %v3330_v53 = vld [vmem:[%s4378_s0 + $0x2e4] ss:$28 sps:$4 sm:$0xff]   ;;  %v3332_v54 = vld [vmem:[%s4378_s0 + $0x12c] ss:$28 sps:$4 sm:$0xff]  }
  0x88   :  { %v3329_v52 = vld [vmem:[%s4378_s0 + $0xf0] ss:$28 sps:$4 sm:$0xff]   ;;  %v3334_v55 = vld [vmem:[%s4378_s0 + $0x2e0] ss:$28 sps:$4 sm:$0xff]   ;;  %v3335_v56 = vld [vmem:[%s4378_s0 + $0x128] ss:$28 sps:$4 sm:$0xff]  }
  0x89   :  { %v3336_v57 = vld [vmem:[%s4378_s0 + $0x31c] ss:$28 sps:$4 sm:$0xff]   ;;  %v3338_v58 = vld [vmem:[%s4378_s0 + $0x164] ss:$28 sps:$4 sm:$0xff]   ;;  %v3342_v61 = vld [vmem:[%s4378_s0 + $0x354] ss:$28 sps:$4 sm:$0xff]  }
  0x8a   :  { %1430 = vmatmul.mubr.bf16.gmra.mrb[52].mxu1 %v3310_v39  ;;  %1527 = vmatmul.mubr.bf16.gmra.mrb[52].mxu0 %v3311_v40  ;;  %v3340_v59 = vld [vmem:[%s4378_s0 + $0x318] ss:$28 sps:$4 sm:$0xff]   ;;  %v3341_v60 = vld [vmem:[%s4378_s0 + $0x160] ss:$28 sps:$4 sm:$0xff]   ;;  %v3346_v63 = vld [vmem:[%s4378_s0 + $0x350] ss:$28 sps:$4 sm:$0xff]  }
  0x8b   :  { %1437 = vmatprep.mubr.bf16.mxu1 %v3312_v41  ;;  %1534 = vmatprep.mubr.bf16.mxu0 %v3314_v42  ;;  %v3344_v62 = vld [vmem:[%s4378_s0 + $0x19c] ss:$28 sps:$4 sm:$0xff]   ;;  %v3348_v1 = vld [vmem:[%s4378_s0 + $0x1d4] ss:$28 sps:$4 sm:$0xff]   ;;  %vm1115_vm0 = vcmask 130048   ;;  %v3388_v23 = vld [vmem:[%s4381_s3] sm:$0xff]  }
  0x8c   :  { %v3347_v0 = vld [vmem:[%s4378_s0 + $0x198] ss:$28 sps:$4 sm:$0xff]   ;;  %v3351_v3 = vld [vmem:[%s4378_s0 + $0x1d0] ss:$28 sps:$4 sm:$0xff]   ;;  %v3355_v6 = vld [vmem:[%s4378_s0 + $0x88] ss:$28 sps:$4 sm:$0xff]   ;;  %3072 = vmatprep.subr.bf16.mxu1 %v3388_v23 }
  0x8d   :  { %v3350_v2 = vld [vmem:[%s4378_s0 + $0x18] ss:$28 sps:$4 sm:$0xff]   ;;  %v3352_v4 = vld [vmem:[%s4378_s0 + $0x50] ss:$28 sps:$4 sm:$0xff]   ;;  %v3356_v7 = vld [vmem:[%s4378_s0 + $0x208] ss:$28 sps:$4 sm:$0xff]  }
  0x8e   :  { %v3353_v5 = vld [vmem:[%s4378_s0 + $0x20c] ss:$28 sps:$4 sm:$0xff]   ;;  %v3357_v8 = vld [vmem:[%s4378_s0 + $0xc0] ss:$28 sps:$4 sm:$0xff]   ;;  %v3360_v10 = vld [vmem:[%s4378_s0 + $0xf8] ss:$28 sps:$4 sm:$0xff]  }
  0x8f   :  { %v3358_v9 = vld [vmem:[%s4378_s0 + $0x244] ss:$28 sps:$4 sm:$0xff]   ;;  %v3362_v12 = vld [vmem:[%s4378_s0 + $0x130] ss:$28 sps:$4 sm:$0xff]   ;;  %v3363_v13 = vld [vmem:[%s4378_s0 + $0x27c] ss:$28 sps:$4 sm:$0xff]  }
  0x90   :  { %v3361_v11 = vld [vmem:[%s4378_s0 + $0x240] ss:$28 sps:$4 sm:$0xff]   ;;  %v3365_v14 = vld [vmem:[%s4378_s0 + $0x168] ss:$28 sps:$4 sm:$0xff]   ;;  %v3366_v15 = vld [vmem:[%s4378_s0 + $0x278] ss:$28 sps:$4 sm:$0xff]  }
  0x91   :  { %v3367_v16 = vld [vmem:[%s4378_s0 + $0x1a0] ss:$28 sps:$4 sm:$0xff]   ;;  %v3368_v17 = vld [vmem:[%s4378_s0 + $0x2b4] ss:$28 sps:$4 sm:$0xff]   ;;  %v3373_v21 = vld [vmem:[%s4378_s0 + $0x2ec] ss:$28 sps:$4 sm:$0xff]  }
  0x92   :  { %1438 = vmatmul.mubr.bf16.gmra.mrb[56].mxu1 %v3316_v43  ;;  %1535 = vmatmul.mubr.bf16.gmra.mrb[56].mxu0 %v3317_v44  ;;  %v3370_v18 = vld [vmem:[%s4378_s0 + $0x1d8] ss:$28 sps:$4 sm:$0xff]   ;;  %v3371_v19 = vld [vmem:[%s4378_s0 + $0x2b0] ss:$28 sps:$4 sm:$0xff]   ;;  %v3375_v22 = vld [vmem:[%s4378_s0 + $0x248] ss:$28 sps:$4 sm:$0xff]  }
  0x93   :  { %1445 = vmatprep.mubr.bf16.mxu1 %v3318_v45  ;;  %1542 = vmatprep.mubr.bf16.mxu0 %v3320_v46  ;;  %v3372_v20 = vld [vmem:[%s4378_s0 + $0x210] ss:$28 sps:$4 sm:$0xff]   ;;  %v3376_v24 = vld [vmem:[%s4378_s0 + $0x2e8] ss:$28 sps:$4 sm:$0xff]   ;;  %v3377_v25 = vld [vmem:[%s4378_s0 + $0x280] ss:$28 sps:$4 sm:$0xff]  }
  0x94   :  { %v3378_v26 = vld [vmem:[%s4378_s0 + $0x324] ss:$28 sps:$4 sm:$0xff]   ;;  %v3380_v27 = vld [vmem:[%s4378_s0 + $0x2b8] ss:$28 sps:$4 sm:$0xff]   ;;  %v3389_v28 = vld [vmem:[%s4381_s3 + $0x8] sm:$0xff]   ;;  %vm2175_vm1 = vcmask 523264  }
  0x95   :  { %v3381_v29 = vld [vmem:[%s4378_s0 + $0x320] ss:$28 sps:$4 sm:$0xff]   ;;  %v3382_v30 = vld [vmem:[%s4378_s0 + $0x2f0] ss:$28 sps:$4 sm:$0xff]   ;;  %v3385_v32 = vld [vmem:[%s4378_s0 + $0x328] ss:$28 sps:$4 sm:$0xff]  }
  0x96   :  { %v3383_v31 = vld [vmem:[%s4378_s0 + $0x35c] ss:$28 sps:$4 sm:$0xff]   ;;  %v3390_v33 = vld [vmem:[%s4381_s3 + $0x10] sm:$0xff]  }
  0x97   :  { %v3386_v38 = vld [vmem:[%s4378_s0 + $0x358] ss:$28 sps:$4 sm:$0xff]   ;;  %v3387_v39 = vld [vmem:[%s4378_s0 + $0x360] ss:$28 sps:$4 sm:$0xff]  }
  0x9a   :  { %1446 = vmatmul.mubr.bf16.gmra.mrb[60].mxu1 %v3322_v47  ;;  %1543 = vmatmul.mubr.bf16.gmra.mrb[60].mxu0 %v3323_v48  ;;  %v3391_v48 = vld [vmem:[%s4381_s3 + $0x18] sm:$0xff]  }
  0x9b   :  { %1453 = vmatprep.mubr.bf16.mxu1 %v3324_v49  ;;  %1550 = vmatprep.mubr.bf16.mxu0 %v3326_v50 }
  0xa2   :  { %1454 = vmatmul.mubr.bf16.gmra.mrb[64].mxu1 %v3328_v51  ;;  %1551 = vmatmul.mubr.bf16.gmra.mrb[64].mxu0 %v3329_v52 }
  0xa3   :  { %1461 = vmatprep.mubr.bf16.mxu1 %v3330_v53  ;;  %1558 = vmatprep.mubr.bf16.mxu0 %v3332_v54 }
  0xaa   :  { %1462 = vmatmul.mubr.bf16.gmra.mrb[68].mxu1 %v3334_v55  ;;  %1559 = vmatmul.mubr.bf16.gmra.mrb[68].mxu0 %v3335_v56 }
  0xab   :  { %1469 = vmatprep.mubr.bf16.mxu1 %v3336_v57  ;;  %1566 = vmatprep.mubr.bf16.mxu0 %v3338_v58 }
  0xb2   :  { %1470 = vmatmul.mubr.bf16.gmra.mrb[72].mxu1 %v3340_v59  ;;  %1567 = vmatmul.mubr.bf16.gmra.mrb[72].mxu0 %v3341_v60 }
  0xb3   :  { %1477 = vmatprep.mubr.bf16.mxu1 %v3342_v61  ;;  %1574 = vmatprep.mubr.bf16.mxu0 %v3344_v62  ;;  %v3392_v61 = vld [vmem:[%s4381_s3 + $0x20] sm:$0xff]  }
  0xba   :  { %1478 = vmatmul.mubr.bf16.gmra.mrb[76].mxu1 %v3346_v63  ;;  %1575 = vmatmul.mubr.bf16.gmra.mrb[76].mxu0 %v3347_v0 }
  0xbb   :  { %1582 = vmatprep.mubr.bf16.mxu0 %v3348_v1  ;;  %3040 = vmatprep.mubr.msk.bf16.mxu1 %vm1115_vm0, %v3350_v2 }
  0xc2   :  { %1583 = vmatmul.mubr.bf16.gmra.mrb[80].mxu0 %v3351_v3  ;;  %3041 = vmatmul.mubr.msk.bf16.vlgmr.msra.gmra.mrb[80].mxu1 %vm1115_vm0, %v3352_v4 }
  0xc3   :  { %1590 = vmatprep.mubr.bf16.mxu0 %v3353_v5  ;;  %3044 = vmatprep.mubr.msk.bf16.mxu1 %vm1115_vm0, %v3355_v6 }
  0xc4   :  { %3073 = vmatpush3.bf16.msra.mxu1 %v3388_v23  ;;  %v3394_v23 = vld [vmem:[%s4381_s3 + $0x30] sm:$0xff]  }
  0xc5   :  { %3074 = vmatprep.subr.bf16.mxu1 %v3389_v28 }
  0xc8   :  { %3075 = vmatpush3.bf16.msra.mxu1 %v3389_v28 }
  0xc9   :  { %3076 = vmatprep.subr.bf16.mxu1 %v3390_v33 }
  0xca   :  { %1591 = vmatmul.mubr.bf16.gmra.mrb[84].mxu0 %v3356_v7  ;;  %3045 = vmatmul.mubr.msk.bf16.gmra.mrb[84].mxu1 %vm1115_vm0, %v3357_v8 }
  0xcb   :  { %1598 = vmatprep.mubr.bf16.mxu0 %v3358_v9  ;;  %3048 = vmatprep.mubr.msk.bf16.mxu1 %vm1115_vm0, %v3360_v10  ;;  %v3393_v10 = vld [vmem:[%s4381_s3 + $0x28] sm:$0xff]  }
  0xcc   :  { %3077 = vmatpush3.bf16.msra.mxu1 %v3390_v33 }
  0xcd   :  { %3078 = vmatprep.subr.bf16.mxu1 %v3391_v48 }
  0xd0   :  { %3079 = vmatpush3.bf16.msra.mxu1 %v3391_v48 }
  0xd1   :  { %3080 = vmatprep.subr.bf16.mxu1 %v3392_v61 }
  0xd2   :  { %1599 = vmatmul.mubr.bf16.gmra.mrb[88].mxu0 %v3361_v11  ;;  %3049 = vmatmul.mubr.msk.bf16.gmra.mrb[88].mxu1 %vm1115_vm0, %v3362_v12 }
  0xd3   :  { %1606 = vmatprep.mubr.bf16.mxu0 %v3363_v13  ;;  %3052 = vmatprep.mubr.msk.bf16.mxu1 %vm1115_vm0, %v3365_v14 }
  0xd4   :  { %3081 = vmatpush3.bf16.msra.mxu1 %v3392_v61 }
  0xd5   :  { %3082 = vmatprep.subr.bf16.mxu1 %v3393_v10 }
  0xd8   :  { %3083 = vmatpush3.bf16.msra.mxu1 %v3393_v10 }
  0xd9   :  { %3084 = vmatprep.subr.bf16.mxu1 %v3394_v23 }
  0xda   :  { %1607 = vmatmul.mubr.bf16.gmra.mrb[92].mxu0 %v3366_v15  ;;  %3053 = vmatmul.mubr.msk.bf16.gmra.mrb[92].mxu1 %vm1115_vm0, %v3367_v16 }
  0xdb   :  { %1614 = vmatprep.mubr.bf16.mxu0 %v3368_v17  ;;  %3056 = vmatprep.mubr.msk.bf16.mxu1 %vm1115_vm0, %v3370_v18 }
  0xdc   :  { %3085 = vmatpush3.bf16.msra.mxu1 %v3394_v23 }
  0xe2   :  { %1615 = vmatmul.mubr.bf16.gmra.mrb[96].mxu0 %v3371_v19  ;;  %3057 = vmatmul.mubr.msk.bf16.gmra.mrb[96].mxu1 %vm1115_vm0, %v3372_v20 }
  0xe3   :  { %1622 = vmatprep.mubr.bf16.mxu0 %v3373_v21  ;;  %3060 = vmatprep.mubr.msk.bf16.mxu1 %vm1115_vm0, %v3375_v22 }
  0xea   :  { %1623 = vmatmul.mubr.bf16.gmra.mrb[100].mxu0 %v3376_v24  ;;  %3061 = vmatmul.mubr.msk.bf16.gmra.mrb[100].mxu1 %vm1115_vm0, %v3377_v25  ;;  %v4022_v24 = vld [vmem:[%s4380_s2] ss:$0 sm:$0xff] }
  0xeb   :  { %1630 = vmatprep.mubr.bf16.mxu0 %v3378_v26  ;;  %3064 = vmatprep.mubr.msk.bf16.mxu1 %vm1115_vm0, %v3380_v27 }
  0xf2   :  { %1631 = vmatmul.mubr.bf16.gmra.mrb[104].mxu0 %v3381_v29  ;;  %3065 = vmatmul.mubr.msk.bf16.gmra.mrb[104].mxu1 %vm1115_vm0, %v3382_v30 }
  0xf3   :  { %1638 = vmatprep.mubr.bf16.mxu0 %v3383_v31  ;;  %3068 = vmatprep.mubr.msk.bf16.mxu1 %vm1115_vm0, %v3385_v32 }
  0xf5   :  { %v2657_v34 = vpop.f32.mrb[0].mxu0  ;;  %v2729_v35 = vpop.f32.mrb[0].mxu1 }
  0xf6   :  { %v2658_v36 = vpop.f32.mrb[1].mxu0  ;;  %v2730_v37 = vpop.f32.mrb[1].mxu1 }
  0xf7   :  { %v3974_v40 = vadd.f32 %v2658_v36, %v2657_v34  ;;  %v2660_v41 = vpop.f32.mrb[2].mxu0  ;;  %v3976_v42 = vadd.f32 %v2730_v37, %v2729_v35  ;;  %v2732_v43 = vpop.f32.mrb[2].mxu1 }
  0xf8   :  { %v2661_v44 = vpop.f32.mrb[3].mxu0  ;;  %v2733_v45 = vpop.f32.mrb[3].mxu1 }
  0xf9   :  { %v3978_v46 = vadd.f32 %v2661_v44, %v2660_v41  ;;  %v3980_v47 = vadd.f32 %v2733_v45, %v2732_v43  ;;  %v1199_v29 = vadd.f32 %v3974_v40, %v4022_v24  ;;  %v3395_v41 = vld [vmem:[%s4381_s3 + $0x38] sm:$0xff]  }
  0xfa   :  { %1639 = vmatmul.mubr.bf16.gmra.mrb[108].mxu0 %v3386_v38  ;;  %3069 = vmatmul.mubr.msk.bf16.gmra.mrb[108].mxu1 %vm1115_vm0, %v3387_v39 }
  0xfb   :  { %v1202_v36 = vadd.f32 %v3978_v46, %v4022_v24  ;;  %3086 = vmatprep.subr.bf16.mxu1 %v3395_v41 }
  0xfc   :  { %3087 = vmatpush3.bf16.msra.mxu1 %v3395_v41 }
  0xfd   :  { %v2663_v49 = vpop.f32.mrb[4].mxu0  ;;  %v2735_v50 = vpop.f32.mrb[4].mxu1 }
  0xfe   :  { %v2664_v51 = vpop.f32.mrb[5].mxu0  ;;  %v2736_v52 = vpop.f32.mrb[5].mxu1 }
  0xff   :  { %v3986_v53 = vadd.f32 %v2664_v51, %v2663_v49  ;;  %v2666_v54 = vpop.f32.mrb[6].mxu0  ;;  %v3988_v55 = vadd.f32 %v2736_v52, %v2735_v50  ;;  %v2738_v56 = vpop.f32.mrb[6].mxu1 }
 0x100   :  { %v2667_v57 = vpop.f32.mrb[7].mxu0  ;;  %v2739_v58 = vpop.f32.mrb[7].mxu1 }
 0x101   :  { %v3990_v59 = vadd.f32 %v2667_v57, %v2666_v54  ;;  %v3992_v60 = vadd.f32 %v2739_v58, %v2738_v56  ;;  %v1207_v46 = vadd.f32 %v3986_v53, %v4022_v24 }
 0x103   :  { %v1210_v57 = vadd.f32 %v3990_v59, %v4022_v24 }
 0x105   :  { %v2669_v62 = vpop.f32.mrb[8].mxu0  ;;  %v2741_v63 = vpop.f32.mrb[8].mxu1 }
 0x106   :  { %v2670_v0 = vpop.f32.mrb[9].mxu0  ;;  %v2742_v1 = vpop.f32.mrb[9].mxu1 }
 0x107   :  { %v3997_v2 = vadd.f32 %v2670_v0, %v2669_v62  ;;  %v2672_v3 = vpop.f32.mrb[10].mxu0  ;;  %v3999_v4 = vadd.f32 %v2742_v1, %v2741_v63  ;;  %v2744_v5 = vpop.f32.mrb[10].mxu1 }
 0x108   :  { %v2673_v6 = vpop.f32.mrb[11].mxu0  ;;  %v2745_v7 = vpop.f32.mrb[11].mxu1 }
 0x109   :  { %v4001_v8 = vadd.f32 %v2673_v6, %v2672_v3  ;;  %v4003_v9 = vadd.f32 %v2745_v7, %v2744_v5  ;;  %v1215_v5 = vadd.f32 %v3997_v2, %v4022_v24 }
 0x10d   :  { %v2675_v11 = vpop.f32.mrb[12].mxu0  ;;  %v2747_v12 = vpop.f32.mrb[12].mxu1 }
 0x10e   :  { %v2676_v13 = vpop.f32.mrb[13].mxu0  ;;  %v2748_v14 = vpop.f32.mrb[13].mxu1 }
 0x10f   :  { %v4008_v15 = vadd.f32 %v2676_v13, %v2675_v11  ;;  %v2678_v16 = vpop.f32.mrb[14].mxu0  ;;  %v4010_v17 = vadd.f32 %v2748_v14, %v2747_v12  ;;  %v2750_v18 = vpop.f32.mrb[14].mxu1  ;;  %v1218_v13 = vadd.f32 %v4001_v8, %v4022_v24 }
 0x110   :  { %v2679_v19 = vpop.f32.mrb[15].mxu0  ;;  %v2751_v20 = vpop.f32.mrb[15].mxu1 }
 0x111   :  { %v4012_v21 = vadd.f32 %v2679_v19, %v2678_v16  ;;  %v4014_v22 = vadd.f32 %v2751_v20, %v2750_v18 }
 0x115   :  { %v2681_v25 = vpop.f32.mrb[16].mxu0  ;;  %v2769_v26 = vpop.f32.mrb[16].mxu1 }
 0x116   :  { %v2682_v27 = vpop.f32.mrb[17].mxu0  ;;  %v2770_v28 = vpop.f32.mrb[17].mxu1 }
 0x117   :  { %v4026_v30 = vadd.f32 %v2682_v27, %v2681_v25  ;;  %v2771_v31 = vadd.f32 %v2770_v28, %v2769_v26  ;;  %v2684_v32 = vpop.f32.mrb[18].mxu0  ;;  %v2772_v33 = vpop.f32.mrb[18].mxu1  ;;  %v1223_v26 = vadd.f32 %v4008_v15, %v4022_v24 }
 0x118   :  { %v2685_v34 = vpop.f32.mrb[19].mxu0  ;;  %v2773_v35 = vpop.f32.mrb[19].mxu1 }
 0x119   :  { %v4030_v37 = vadd.f32 %v2771_v31, %v1199_v29  ;;  %v4032_v38 = vadd.f32 %v2685_v34, %v2684_v32  ;;  %v2774_v39 = vadd.f32 %v2773_v35, %v2772_v33  ;;  %v1226_v33 = vadd.f32 %v4012_v21, %v4022_v24 }
 0x11b   :  { %v4037_v40 = vadd.f32 %v2774_v39, %v1202_v36 }
 0x11d   :  { %v2687_v43 = vpop.f32.mrb[20].mxu0  ;;  %v2775_v44 = vpop.f32.mrb[20].mxu1 }
 0x11e   :  { %v2688_v45 = vpop.f32.mrb[21].mxu0  ;;  %v2776_v48 = vpop.f32.mrb[21].mxu1 }
 0x11f   :  { %v4041_v49 = vadd.f32 %v2688_v45, %v2687_v43  ;;  %v2777_v50 = vadd.f32 %v2776_v48, %v2775_v44  ;;  %v2690_v51 = vpop.f32.mrb[22].mxu0  ;;  %v2778_v52 = vpop.f32.mrb[22].mxu1  ;;  %v1231_v45 = vadd.f32 %v4026_v30, %v4022_v24 }
 0x120   :  { %v2691_v54 = vpop.f32.mrb[23].mxu0  ;;  %v2779_v56 = vpop.f32.mrb[23].mxu1 }
 0x121   :  { %v4045_v58 = vadd.f32 %v2777_v50, %v1207_v46  ;;  %v2692_v61 = vadd.f32 %v2691_v54, %v2690_v51  ;;  %v2780_v62 = vadd.f32 %v2779_v56, %v2778_v52  ;;  %v1234_v54 = vadd.f32 %v4032_v38, %v4022_v24 }
 0x123   :  { %v4047_v63 = vadd.f32 %v2780_v62, %v1210_v57 }
 0x125   :  { %v2693_v0 = vpop.f32.mrb[24].mxu0  ;;  %v2781_v1 = vpop.f32.mrb[24].mxu1 }
 0x126   :  { %v2694_v3 = vpop.f32.mrb[25].mxu0  ;;  %v2782_v53 = vpop.f32.mrb[25].mxu1 }
 0x127   :  { %v4051_v6 = vadd.f32 %v2694_v3, %v2693_v0  ;;  %v2783_v7 = vadd.f32 %v2782_v53, %v2781_v1  ;;  %v2696_v10 = vpop.f32.mrb[26].mxu0  ;;  %v2784_v11 = vpop.f32.mrb[26].mxu1 }
 0x128   :  { %v2697_v12 = vpop.f32.mrb[27].mxu0  ;;  %v2785_v59 = vpop.f32.mrb[27].mxu1 }
 0x129   :  { %v4055_v14 = vadd.f32 %v2783_v7, %v1215_v5  ;;  %v2698_v16 = vadd.f32 %v2697_v12, %v2696_v10  ;;  %v2786_v18 = vadd.f32 %v2785_v59, %v2784_v11  ;;  %v1239_v5 = vadd.f32 %v4041_v49, %v4022_v24 }
 0x12b   :  { %v4057_v19 = vadd.f32 %v2786_v18, %v1218_v13  ;;  %v1242_v13 = vadd.f32 %v2692_v61, %v4022_v24 }
 0x12d   :  { %v2699_v20 = vpop.f32.mrb[28].mxu0  ;;  %v2787_v23 = vpop.f32.mrb[28].mxu1 }
 0x12e   :  { %v2700_v25 = vpop.f32.mrb[29].mxu0  ;;  %v2788_v2 = vpop.f32.mrb[29].mxu1 }
 0x12f   :  { %v4061_v27 = vadd.f32 %v2700_v25, %v2699_v20  ;;  %v2789_v28 = vadd.f32 %v2788_v2, %v2787_v23  ;;  %v2702_v29 = vpop.f32.mrb[30].mxu0  ;;  %v2790_v31 = vpop.f32.mrb[30].mxu1 }
 0x130   :  { %v2703_v32 = vpop.f32.mrb[31].mxu0  ;;  %v2791_v8 = vpop.f32.mrb[31].mxu1 }
 0x131   :  { %v4065_v34 = vadd.f32 %v2789_v28, %v1223_v26  ;;  %v2704_v35 = vadd.f32 %v2703_v32, %v2702_v29  ;;  %v2792_v36 = vadd.f32 %v2791_v8, %v2790_v31  ;;  %v1247_v29 = vadd.f32 %v4051_v6, %v4022_v24 }
 0x133   :  { %v4067_v39 = vadd.f32 %v2792_v36, %v1226_v33 }
 0x135   :  { %v2705_v41 = vpop.f32.mrb[32].mxu0  ;;  %v2793_v43 = vpop.f32.mrb[32].mxu1 }
 0x136   :  { %v2706_v44 = vpop.f32.mrb[33].mxu0  ;;  %v2794_v15 = vpop.f32.mrb[33].mxu1 }
 0x137   :  { %v4071_v48 = vadd.f32 %v2706_v44, %v2705_v41  ;;  %v2795_v46 = vadd.f32 %v2794_v15, %v2793_v43  ;;  %v2708_v50 = vpop.f32.mrb[34].mxu0  ;;  %v2796_v51 = vpop.f32.mrb[34].mxu1  ;;  %v1250_v41 = vadd.f32 %v2698_v16, %v4022_v24 }
 0x138   :  { %v2709_v52 = vpop.f32.mrb[35].mxu0  ;;  %v2797_v21 = vpop.f32.mrb[35].mxu1 }
 0x139   :  { %v4075_v56 = vadd.f32 %v2795_v46, %v1231_v45  ;;  %v2710_v57 = vadd.f32 %v2709_v52, %v2708_v50  ;;  %v2798_v62 = vadd.f32 %v2797_v21, %v2796_v51  ;;  %v1255_v52 = vadd.f32 %v4061_v27, %v4022_v24 }
 0x13b   :  { %v4077_v0 = vadd.f32 %v2798_v62, %v1234_v54 }
 0x13d   :  { %v2711_v1 = vpop.f32.mrb[36].mxu0  ;;  %v2799_v3 = vpop.f32.mrb[36].mxu1 }
 0x13e   :  { %v2712_v53 = vpop.f32.mrb[37].mxu0  ;;  %v2800_v30 = vpop.f32.mrb[37].mxu1 }
 0x13f   :  { %v4081_v7 = vadd.f32 %v2712_v53, %v2711_v1  ;;  %v2801_v10 = vadd.f32 %v2800_v30, %v2799_v3  ;;  %v2714_v11 = vpop.f32.mrb[38].mxu0  ;;  %v2802_v12 = vpop.f32.mrb[38].mxu1  ;;  %v1258_v53 = vadd.f32 %v2704_v35, %v4022_v24  ;;  %v1266_v35 = vadd.f32 %v2710_v57, %v4022_v24  ;;  %v3397_v57 = vld [vmem:[%s4383_s5 + $0x8] sm:$0xff]  }
 0x140   :  { %v2715_v59 = vpop.f32.mrb[39].mxu0  ;;  %v2803_v38 = vpop.f32.mrb[39].mxu1 }
 0x141   :  { %v4084_v18 = vadd.f32 %v2801_v10, %v1239_v5  ;;  %v4086_v20 = vadd.f32 %v2715_v59, %v2714_v11  ;;  %v2804_v23 = vadd.f32 %v2803_v38, %v2802_v12 }
 0x143   :  { %v4088_v25 = vadd.f32 %v2804_v23, %v1242_v13  ;;  %v1263_v13 = vadd.f32 %v4071_v48, %v4022_v24  ;;  %v3396_v48 = vld [vmem:[%s4383_s5] sm:$0xff]  }
 0x144   :  { %3120 = vmatprep.subr.bf16.mxu0 %v3396_v48 }
 0x145   :  { %v2717_v2 = vpop.f32.mrb[40].mxu0  ;;  %v2805_v26 = vpop.f32.mrb[40].mxu1  ;;  %3121 = vmatpush3.bf16.msra.mxu0 %v3396_v48 }
 0x146   :  { %v2718_v28 = vpop.f32.mrb[41].mxu0  ;;  %v2806_v49 = vpop.f32.mrb[41].mxu1  ;;  %3122 = vmatprep.subr.bf16.mxu0 %v3397_v57 }
 0x147   :  { %v4092_v31 = vadd.f32 %v2718_v28, %v2717_v2  ;;  %v2807_v32 = vadd.f32 %v2806_v49, %v2805_v26  ;;  %v2720_v8 = vpop.f32.mrb[42].mxu0  ;;  %v2808_v33 = vpop.f32.mrb[42].mxu1 }
 0x148   :  { %v2721_v61 = vpop.f32.mrb[43].mxu0  ;;  %v2809_v36 = vpop.f32.mrb[43].mxu1 }
 0x149   :  { %v4095_v43 = vadd.f32 %v2807_v32, %v1247_v29  ;;  %v4097_v44 = vadd.f32 %v2721_v61, %v2720_v8  ;;  %v2810_v15 = vadd.f32 %v2809_v36, %v2808_v33  ;;  %3123 = vmatpush3.bf16.msra.mxu0 %v3397_v57 }
 0x14b   :  { %v4099_v45 = vadd.f32 %v2810_v15, %v1250_v41 }
 0x14d   :  { %v2723_v46 = vpop.f32.mrb[44].mxu0  ;;  %v2811_v50 = vpop.f32.mrb[44].mxu1 }
 0x14e   :  { %v2724_v51 = vpop.f32.mrb[45].mxu0  ;;  %v2812_v6 = vpop.f32.mrb[45].mxu1 }
 0x14f   :  { %v4103_v21 = vadd.f32 %v2724_v51, %v2723_v46  ;;  %v2813_v54 = vadd.f32 %v2812_v6, %v2811_v50  ;;  %v2726_v62 = vpop.f32.mrb[46].mxu0  ;;  %v2814_v1 = vpop.f32.mrb[46].mxu1 }
 0x150   :  { %v2727_v16 = vpop.f32.mrb[47].mxu0  ;;  %v2815_v3 = vpop.f32.mrb[47].mxu1 }
 0x151   :  { %v4106_v30 = vadd.f32 %v2813_v54, %v1255_v52  ;;  %v4108_v5 = vadd.f32 %v2727_v16, %v2726_v62  ;;  %v2816_v10 = vadd.f32 %v2815_v3, %v2814_v1  ;;  %v3398_v62 = vld [vmem:[%s4383_s5 + $0x10] sm:$0xff]   ;;  %v1274_v1 = vadd.f32 %v4086_v20, %v4022_v24  ;;  %v3399_v20 = vld [vmem:[%s4383_s5 + $0x18] sm:$0xff]  }
 0x152   :  { %3124 = vmatprep.subr.bf16.mxu0 %v3398_v62 }
 0x153   :  { %v4110_v11 = vadd.f32 %v2816_v10, %v1258_v53  ;;  %3125 = vmatpush3.bf16.msra.mxu0 %v3398_v62 }
 0x154   :  { %3126 = vmatprep.subr.bf16.mxu0 %v3399_v20 }
 0x155   :  { %v2817_v12 = vpop.f32.mrb[48].mxu1  ;;  %v2881_v59 = vpop.f32.mrb[48].mxu0 }
 0x156   :  { %v2818_v38 = vpop.f32.mrb[49].mxu1  ;;  %v2882_v27 = vpop.f32.mrb[49].mxu0 }
 0x157   :  { %v2819_v23 = vadd.f32 %v2818_v38, %v2817_v12  ;;  %v2883_v2 = vadd.f32 %v2882_v27, %v2881_v59  ;;  %v2820_v26 = vpop.f32.mrb[50].mxu1  ;;  %v2884_v28 = vpop.f32.mrb[50].mxu0  ;;  %3127 = vmatpush3.bf16.msra.mxu0 %v3399_v20 }
 0x158   :  { %v2821_v49 = vpop.f32.mrb[51].mxu1  ;;  %v2885_v29 = vpop.f32.mrb[51].mxu0 }
 0x159   :  { %v4115_v32 = vadd.f32 %v2819_v23, %v1263_v13  ;;  %v2822_v8 = vadd.f32 %v2821_v49, %v2820_v26  ;;  %v2886_v33 = vadd.f32 %v2885_v29, %v2884_v28  ;;  %v4118_v61 = vadd.f32 %v2883_v2, %v4030_v37 }
 0x15a   :  { %v1271_v37 = vadd.f32 %v4081_v7, %v4022_v24 }
 0x15b   :  { %v4120_v36 = vadd.f32 %v2822_v8, %v1266_v35  ;;  %v4123_v41 = vadd.f32 %v2886_v33, %v4037_v40 }
 0x15d   :  { %v2823_v15 = vpop.f32.mrb[52].mxu1  ;;  %v2887_v46 = vpop.f32.mrb[52].mxu0 }
 0x15e   :  { %v2824_v50 = vpop.f32.mrb[53].mxu1  ;;  %v2888_v51 = vpop.f32.mrb[53].mxu0 }
 0x15f   :  { %v2825_v6 = vadd.f32 %v2824_v50, %v2823_v15  ;;  %v2889_v40 = vadd.f32 %v2888_v51, %v2887_v46  ;;  %v2826_v52 = vpop.f32.mrb[54].mxu1  ;;  %v2890_v54 = vpop.f32.mrb[54].mxu0 }
 0x160   :  { %v2827_v16 = vpop.f32.mrb[55].mxu1  ;;  %v2891_v3 = vpop.f32.mrb[55].mxu0 }
 0x161   :  { %v4138_v53 = vadd.f32 %v2825_v6, %v1271_v37  ;;  %v2828_v10 = vadd.f32 %v2827_v16, %v2826_v52  ;;  %v2892_v12 = vadd.f32 %v2891_v3, %v2890_v54  ;;  %v4141_v7 = vadd.f32 %v2889_v40, %v4045_v58 }
 0x162   :  { %v1279_v58 = vadd.f32 %v4092_v31, %v4022_v24 }
 0x163   :  { %v4143_v59 = vadd.f32 %v2828_v10, %v1274_v1  ;;  %v4146_v38 = vadd.f32 %v2892_v12, %v4047_v63  ;;  %v1282_v63 = vadd.f32 %v4097_v44, %v4022_v24  ;;  %v1287_v44 = vadd.f32 %v4103_v21, %v4022_v24 }
 0x165   :  { %v2829_v27 = vpop.f32.mrb[56].mxu1  ;;  %v2893_v13 = vpop.f32.mrb[56].mxu0 }
 0x166   :  { %v2830_v23 = vpop.f32.mrb[57].mxu1  ;;  %v2894_v2 = vpop.f32.mrb[57].mxu0 }
 0x167   :  { %v2831_v26 = vadd.f32 %v2830_v23, %v2829_v27  ;;  %v2895_v28 = vadd.f32 %v2894_v2, %v2893_v13  ;;  %v2832_v35 = vpop.f32.mrb[58].mxu1  ;;  %v2896_v49 = vpop.f32.mrb[58].mxu0 }
 0x168   :  { %v2833_v29 = vpop.f32.mrb[59].mxu1  ;;  %v2897_v8 = vpop.f32.mrb[59].mxu0 }
 0x169   :  { %v4155_v33 = vadd.f32 %v2831_v26, %v1279_v58  ;;  %v2834_v48 = vadd.f32 %v2833_v29, %v2832_v35  ;;  %v2898_v57 = vadd.f32 %v2897_v8, %v2896_v49  ;;  %v4158_v15 = vadd.f32 %v2895_v28, %v4055_v14 }
 0x16a   :  { %v1290_v14 = vadd.f32 %v4108_v5, %v4022_v24  ;;  %v1295_v5 = vadd.f32 %v3976_v42, %v4022_v24 }
 0x16b   :  { %v4160_v46 = vadd.f32 %v2834_v48, %v1282_v63  ;;  %v4163_v31 = vadd.f32 %v2898_v57, %v4057_v19 }
 0x16d   :  { %v2835_v50 = vpop.f32.mrb[60].mxu1  ;;  %v2899_v51 = vpop.f32.mrb[60].mxu0 }
 0x16e   :  { %v2836_v37 = vpop.f32.mrb[61].mxu1  ;;  %v2900_v6 = vpop.f32.mrb[61].mxu0 }
 0x16f   :  { %v2837_v40 = vadd.f32 %v2836_v37, %v2835_v50  ;;  %v2901_v52 = vadd.f32 %v2900_v6, %v2899_v51  ;;  %v2838_v54 = vpop.f32.mrb[62].mxu1  ;;  %v2902_v62 = vpop.f32.mrb[62].mxu0 }
 0x170   :  { %v2839_v1 = vpop.f32.mrb[63].mxu1  ;;  %v2903_v16 = vpop.f32.mrb[63].mxu0 }
 0x171   :  { %v4169_v3 = vadd.f32 %v2837_v40, %v1287_v44  ;;  %v2840_v19 = vadd.f32 %v2839_v1, %v2838_v54  ;;  %v2904_v10 = vadd.f32 %v2903_v16, %v2902_v62  ;;  %v4172_v12 = vadd.f32 %v2901_v52, %v4065_v34 }
 0x172   :  { %v1298_v34 = vadd.f32 %v3980_v47, %v4022_v24  ;;  %v1303_v47 = vadd.f32 %v3988_v55, %v4022_v24 }
 0x173   :  { %v4174_v20 = vadd.f32 %v2840_v19, %v1290_v14  ;;  %v4177_v21 = vadd.f32 %v2904_v10, %v4067_v39 }
 0x175   :  { %v2841_v27 = vpop.f32.mrb[64].mxu1  ;;  %v2905_v13 = vpop.f32.mrb[64].mxu0 }
 0x176   :  { %v2842_v23 = vpop.f32.mrb[65].mxu1  ;;  %v2906_v2 = vpop.f32.mrb[65].mxu0 }
 0x177   :  { %v2843_v58 = vadd.f32 %v2842_v23, %v2841_v27  ;;  %v2907_v26 = vadd.f32 %v2906_v2, %v2905_v13  ;;  %v2844_v28 = vpop.f32.mrb[66].mxu1  ;;  %v2908_v35 = vpop.f32.mrb[66].mxu0 }
 0x178   :  { %v2845_v49 = vpop.f32.mrb[67].mxu1  ;;  %v2909_v63 = vpop.f32.mrb[67].mxu0 }
 0x179   :  { %v4183_v29 = vadd.f32 %v2843_v58, %v1295_v5  ;;  %v2846_v39 = vadd.f32 %v2845_v49, %v2844_v28  ;;  %v2910_v8 = vadd.f32 %v2909_v63, %v2908_v35  ;;  %v4186_v48 = vadd.f32 %v2907_v26, %v4075_v56 }
 0x17a   :  { %v1306_v56 = vadd.f32 %v3992_v60, %v4022_v24  ;;  %v1311_v60 = vadd.f32 %v3999_v4, %v4022_v24 }
 0x17b   :  { %v4188_v57 = vadd.f32 %v2846_v39, %v1298_v34  ;;  %v4191_v42 = vadd.f32 %v2910_v8, %v4077_v0 }
 0x17d   :  { %v2847_v50 = vpop.f32.mrb[68].mxu1  ;;  %v2911_v51 = vpop.f32.mrb[68].mxu0 }
 0x17e   :  { %v2848_v37 = vpop.f32.mrb[69].mxu1  ;;  %v2912_v6 = vpop.f32.mrb[69].mxu0 }
 0x17f   :  { %v2849_v44 = vadd.f32 %v2848_v37, %v2847_v50  ;;  %v2913_v40 = vadd.f32 %v2912_v6, %v2911_v51  ;;  %v2850_v52 = vpop.f32.mrb[70].mxu1  ;;  %v2914_v54 = vpop.f32.mrb[70].mxu0 }
 0x180   :  { %v2851_v62 = vpop.f32.mrb[71].mxu1  ;;  %v2915_v14 = vpop.f32.mrb[71].mxu0 }
 0x181   :  { %v4197_v1 = vadd.f32 %v2849_v44, %v1303_v47  ;;  %v2852_v0 = vadd.f32 %v2851_v62, %v2850_v52  ;;  %v2916_v16 = vadd.f32 %v2915_v14, %v2914_v54  ;;  %v4200_v19 = vadd.f32 %v2913_v40, %v4084_v18 }
 0x182   :  { %v1314_v18 = vadd.f32 %v4003_v9, %v4022_v24  ;;  %v1319_v9 = vadd.f32 %v4010_v17, %v4022_v24 }
 0x183   :  { %v4202_v10 = vadd.f32 %v2852_v0, %v1306_v56  ;;  %v4205_v55 = vadd.f32 %v2916_v16, %v4088_v25 }
 0x185   :  { %v2853_v27 = vpop.f32.mrb[72].mxu1  ;;  %v2917_v13 = vpop.f32.mrb[72].mxu0 }
 0x186   :  { %v2854_v23 = vpop.f32.mrb[73].mxu1  ;;  %v2918_v2 = vpop.f32.mrb[73].mxu0 }
 0x187   :  { %v2855_v5 = vadd.f32 %v2854_v23, %v2853_v27  ;;  %v2919_v58 = vadd.f32 %v2918_v2, %v2917_v13  ;;  %v2856_v26 = vpop.f32.mrb[74].mxu1  ;;  %v2920_v28 = vpop.f32.mrb[74].mxu0 }
 0x188   :  { %v2857_v35 = vpop.f32.mrb[75].mxu1  ;;  %v2921_v34 = vpop.f32.mrb[75].mxu0 }
 0x189   :  { %v4211_v49 = vadd.f32 %v2855_v5, %v1311_v60  ;;  %v2858_v25 = vadd.f32 %v2857_v35, %v2856_v26  ;;  %v2922_v63 = vadd.f32 %v2921_v34, %v2920_v28  ;;  %v4214_v39 = vadd.f32 %v2919_v58, %v4095_v43 }
 0x18a   :  { %v1322_v43 = vadd.f32 %v4014_v22, %v4022_v24 }
 0x18b   :  { %v4216_v8 = vadd.f32 %v2858_v25, %v1314_v18  ;;  %v4219_v4 = vadd.f32 %v2922_v63, %v4099_v45 }
 0x18d   :  { %v2859_v50 = vpop.f32.mrb[76].mxu1  ;;  %v2923_v51 = vpop.f32.mrb[76].mxu0 }
 0x18e   :  { %v2860_v37 = vpop.f32.mrb[77].mxu1  ;;  %v2924_v6 = vpop.f32.mrb[77].mxu0 }
 0x18f   :  { %v2861_v47 = vadd.f32 %v2860_v37, %v2859_v50  ;;  %v2925_v44 = vadd.f32 %v2924_v6, %v2923_v51  ;;  %v2862_v40 = vpop.f32.mrb[78].mxu1  ;;  %v2926_v52 = vpop.f32.mrb[78].mxu0 }
 0x190   :  { %v2863_v54 = vpop.f32.mrb[79].mxu1  ;;  %v2927_v56 = vpop.f32.mrb[79].mxu0 }
 0x191   :  { %v4225_v62 = vadd.f32 %v2861_v47, %v1319_v9  ;;  %v2864_v45 = vadd.f32 %v2863_v54, %v2862_v40  ;;  %v2928_v14 = vadd.f32 %v2927_v56, %v2926_v52  ;;  %v4228_v0 = vadd.f32 %v2925_v44, %v4106_v30 }
 0x193   :  { %v4230_v16 = vadd.f32 %v2864_v45, %v1322_v43  ;;  %v4233_v17 = vadd.f32 %v2928_v14, %v4110_v11 }
 0x195   :  { %v2929_v27 = vpop.f32.mrb[80].mxu0  ;;  %v3042_v13 = vpop.f32.mrb[80].mxu1 }
 0x196   :  { %v1690_v23 = vadd.f32 %v3042_v13, %v4141_v7  ;;  %v2930_v2 = vpop.f32.mrb[81].mxu0  ;;  %v1681_v22 = vpop.f32.mrb[81].mxu1 }
 0x197   :  { %v2931_v24 = vadd.f32 %v2930_v2, %v2929_v27  ;;  %v1682_v60 = vadd.f32 %v1681_v22, %v4118_v61  ;;  %v2932_v5 = vpop.f32.mrb[82].mxu0  ;;  %v3043_v58 = vpop.f32.mrb[82].mxu1 }
 0x198   :  { %v1693_v26 = vadd.f32 %v3043_v58, %v4146_v38  ;;  %v2933_v30 = vpop.f32.mrb[83].mxu0  ;;  %v1684_v28 = vpop.f32.mrb[83].mxu1  ;;  %v1810_v34 = vmax.f32 %v1690_v23, 0.0 }
 0x199   :  { %v2934_v18 = vadd.f32 %v2933_v30, %v2932_v5  ;;  %v1685_v35 = vadd.f32 %v1684_v28, %v4123_v41  ;;  %v4240_v11 = vadd.f32 %v2931_v24, %v4115_v32  ;;  %v1808_v7 = vmax.f32 %v1682_v60, 0.0 }
 0x19a   :  { %v1811_v25 = vmax.f32 %v1693_v26, 0.0 }
 0x19b   :  { %v1809_v63 = vmax.f32 %v1685_v35, 0.0  ;;  %v4243_v50 = vadd.f32 %v2934_v18, %v4120_v36 }
 0x19c   :  { %v1841_v61 = vpack.c.bf16 %v1811_v25, %v1810_v34 }
 0x19d   :  { %v1840_v51 = vpack.c.bf16 %v1809_v63, %v1808_v7  ;;  %v2935_v37 = vpop.f32.mrb[84].mxu0  ;;  %v3046_v6 = vpop.f32.mrb[84].mxu1 }
 0x19e   :  { %v1706_v38 = vadd.f32 %v3046_v6, %v4172_v12  ;;  %v2936_v9 = vpop.f32.mrb[85].mxu0  ;;  %v1697_v47 = vpop.f32.mrb[85].mxu1 }
 0x19f   :  { %v2937_v44 = vadd.f32 %v2936_v9, %v2935_v37  ;;  %v1698_v41 = vadd.f32 %v1697_v47, %v4158_v15  ;;  %v2938_v32 = vpop.f32.mrb[86].mxu0  ;;  %v3047_v40 = vpop.f32.mrb[86].mxu1  ;;  %3088 = vmatprep.mubr.bf16.mxu1 %v1840_v51 }
 0x1a0   :  { %v1709_v52 = vadd.f32 %v3047_v40, %v4177_v21  ;;  %v2939_v43 = vpop.f32.mrb[87].mxu0  ;;  %v1700_v54 = vpop.f32.mrb[87].mxu1  ;;  %3089 = vmatmul.mubr.bf16.vlgmr.msra.gmra.mrb[112].mxu1 %v1841_v61  ;;  %v1814_v14 = vmax.f32 %v1706_v38, 0.0 }
 0x1a1   :  { %v2940_v36 = vadd.f32 %v2939_v43, %v2938_v32  ;;  %v1701_v56 = vadd.f32 %v1700_v54, %v4163_v31  ;;  %v1593_v45 = vadd.f32 %v2937_v44, %v4138_v53  ;;  %v1812_v27 = vmax.f32 %v1698_v41, 0.0 }
 0x1a2   :  { %v1815_v12 = vmax.f32 %v1709_v52, 0.0 }
 0x1a3   :  { %v1813_v13 = vmax.f32 %v1701_v56, 0.0  ;;  %v1596_v23 = vadd.f32 %v2940_v36, %v4143_v59 }
 0x1a4   :  { %v1843_v15 = vpack.c.bf16 %v1815_v12, %v1814_v14 }
 0x1a5   :  { %v1842_v2 = vpack.c.bf16 %v1813_v13, %v1812_v27  ;;  %v2941_v22 = vpop.f32.mrb[88].mxu0  ;;  %v3050_v24 = vpop.f32.mrb[88].mxu1 }
 0x1a6   :  { %v1722_v21 = vadd.f32 %v3050_v24, %v4200_v19  ;;  %v2942_v60 = vpop.f32.mrb[89].mxu0  ;;  %v1713_v5 = vpop.f32.mrb[89].mxu1 }
 0x1a7   :  { %v2943_v58 = vadd.f32 %v2942_v60, %v2941_v22  ;;  %v1714_v26 = vadd.f32 %v1713_v5, %v4186_v48  ;;  %v2944_v31 = vpop.f32.mrb[90].mxu0  ;;  %v3051_v30 = vpop.f32.mrb[90].mxu1  ;;  %3092 = vmatprep.mubr.bf16.mxu1 %v1842_v2 }
 0x1a8   :  { %v1725_v53 = vadd.f32 %v3051_v30, %v4205_v55  ;;  %v2945_v28 = vpop.f32.mrb[91].mxu0  ;;  %v1716_v18 = vpop.f32.mrb[91].mxu1  ;;  %3093 = vmatmul.mubr.bf16.gmra.mrb[116].mxu1 %v1843_v15  ;;  %v1818_v25 = vmax.f32 %v1722_v21, 0.0 }
 0x1a9   :  { %v2946_v59 = vadd.f32 %v2945_v28, %v2944_v31  ;;  %v1717_v35 = vadd.f32 %v1716_v18, %v4191_v42  ;;  %v1601_v34 = vadd.f32 %v2943_v58, %v4155_v33  ;;  %v1816_v7 = vmax.f32 %v1714_v26, 0.0 }
 0x1aa   :  { %v1819_v19 = vmax.f32 %v1725_v53, 0.0 }
 0x1ab   :  { %v1817_v63 = vmax.f32 %v1717_v35, 0.0  ;;  %v4257_v61 = vadd.f32 %v2946_v59, %v4160_v46 }
 0x1ac   :  { %v1845_v48 = vpack.c.bf16 %v1819_v19, %v1818_v25 }
 0x1ad   :  { %v1844_v51 = vpack.c.bf16 %v1817_v63, %v1816_v7  ;;  %v2947_v37 = vpop.f32.mrb[92].mxu0  ;;  %v3054_v6 = vpop.f32.mrb[92].mxu1 }
 0x1ae   :  { %v1738_v55 = vadd.f32 %v3054_v6, %v4228_v0  ;;  %v2948_v38 = vpop.f32.mrb[93].mxu0  ;;  %v1729_v9 = vpop.f32.mrb[93].mxu1 }
 0x1af   :  { %v2949_v47 = vadd.f32 %v2948_v38, %v2947_v37  ;;  %v1730_v42 = vadd.f32 %v1729_v9, %v4214_v39  ;;  %v2950_v44 = vpop.f32.mrb[94].mxu0  ;;  %v3055_v33 = vpop.f32.mrb[94].mxu1  ;;  %3096 = vmatprep.mubr.bf16.mxu1 %v1844_v51 }
 0x1b0   :  { %v1741_v41 = vadd.f32 %v3055_v33, %v4233_v17  ;;  %v2951_v32 = vpop.f32.mrb[95].mxu0  ;;  %v1732_v40 = vpop.f32.mrb[95].mxu1  ;;  %3097 = vmatmul.mubr.bf16.gmra.mrb[120].mxu1 %v1845_v48  ;;  %v1822_v54 = vmax.f32 %v1738_v55, 0.0 }
 0x1b1   :  { %v2952_v46 = vadd.f32 %v2951_v32, %v2950_v44  ;;  %v1733_v52 = vadd.f32 %v1732_v40, %v4219_v4  ;;  %v1609_v43 = vadd.f32 %v2949_v47, %v4169_v3  ;;  %v1820_v36 = vmax.f32 %v1730_v42, 0.0 }
 0x1b2   :  { %v1823_v0 = vmax.f32 %v1741_v41, 0.0 }
 0x1b3   :  { %v1821_v56 = vmax.f32 %v1733_v52, 0.0  ;;  %v1612_v14 = vadd.f32 %v2952_v46, %v4174_v20 }
 0x1b4   :  { %v1847_v39 = vpack.c.bf16 %v1823_v0, %v1822_v54 }
 0x1b5   :  { %v1846_v12 = vpack.c.bf16 %v1821_v56, %v1820_v36  ;;  %v2953_v27 = vpop.f32.mrb[96].mxu0  ;;  %v3058_v13 = vpop.f32.mrb[96].mxu1 }
 0x1b6   :  { %v1754_v15 = vadd.f32 %v3058_v13, %v1593_v45  ;;  %v2954_v17 = vpop.f32.mrb[97].mxu0  ;;  %v1745_v2 = vpop.f32.mrb[97].mxu1 }
 0x1b7   :  { %v2955_v22 = vadd.f32 %v2954_v17, %v2953_v27  ;;  %v1746_v24 = vadd.f32 %v1745_v2, %v4240_v11  ;;  %v2956_v21 = vpop.f32.mrb[98].mxu0  ;;  %v3059_v4 = vpop.f32.mrb[98].mxu1  ;;  %3100 = vmatprep.mubr.bf16.mxu1 %v1846_v12 }
 0x1b8   :  { %v1757_v3 = vadd.f32 %v3059_v4, %v1596_v23  ;;  %v2957_v60 = vpop.f32.mrb[99].mxu0  ;;  %v1748_v5 = vpop.f32.mrb[99].mxu1  ;;  %3101 = vmatmul.mubr.bf16.gmra.mrb[124].mxu1 %v1847_v39  ;;  %v1826_v31 = vmax.f32 %v1754_v15, 0.0 }
 0x1b9   :  { %v2958_v58 = vadd.f32 %v2957_v60, %v2956_v21  ;;  %v1749_v20 = vadd.f32 %v1748_v5, %v4243_v50  ;;  %v1617_v26 = vadd.f32 %v2955_v22, %v4183_v29  ;;  %v1824_v45 = vmax.f32 %v1746_v24, 0.0 }
 0x1ba   :  { %v1827_v30 = vmax.f32 %v1757_v3, 0.0 }
 0x1bb   :  { %v1825_v53 = vmax.f32 %v1749_v20, 0.0  ;;  %v1620_v28 = vadd.f32 %v2958_v58, %v4188_v57 }
 0x1bc   :  { %v1849_v18 = vpack.c.bf16 %v1827_v30, %v1826_v31 }
 0x1bd   :  { %v1848_v11 = vpack.c.bf16 %v1825_v53, %v1824_v45  ;;  %v2959_v59 = vpop.f32.mrb[100].mxu0  ;;  %v3062_v35 = vpop.f32.mrb[100].mxu1 }
 0x1be   :  { %v1770_v25 = vadd.f32 %v3062_v35, %v1609_v43  ;;  %v2960_v23 = vpop.f32.mrb[101].mxu0  ;;  %v1761_v19 = vpop.f32.mrb[101].mxu1 }
 0x1bf   :  { %v2961_v7 = vadd.f32 %v2960_v23, %v2959_v59  ;;  %v1762_v63 = vadd.f32 %v1761_v19, %v1601_v34  ;;  %v2962_v48 = vpop.f32.mrb[102].mxu0  ;;  %v3063_v51 = vpop.f32.mrb[102].mxu1  ;;  %3104 = vmatprep.mubr.bf16.mxu1 %v1848_v11  ;;  %v4279_v19 = vld [vmem:[%s4382_s4] ss:$0 sm:$0xff] }
 0x1c0   :  { %v1773_v50 = vadd.f32 %v3063_v51, %v1612_v14  ;;  %v2963_v29 = vpop.f32.mrb[103].mxu0  ;;  %v1764_v37 = vpop.f32.mrb[103].mxu1  ;;  %3105 = vmatmul.mubr.bf16.gmra.mrb[128].mxu1 %v1849_v18  ;;  %v1830_v38 = vmax.f32 %v1770_v25, 0.0 }
 0x1c1   :  { %v2964_v6 = vadd.f32 %v2963_v29, %v2962_v48  ;;  %v1765_v55 = vadd.f32 %v1764_v37, %v4257_v61  ;;  %v1625_v57 = vadd.f32 %v2961_v7, %v4197_v1  ;;  %v1828_v47 = vmax.f32 %v1762_v63, 0.0 }
 0x1c2   :  { %v1831_v9 = vmax.f32 %v1773_v50, 0.0 }
 0x1c3   :  { %v1829_v42 = vmax.f32 %v1765_v55, 0.0  ;;  %v1628_v44 = vadd.f32 %v2964_v6, %v4202_v10 }
 0x1c4   :  { %v1851_v33 = vpack.c.bf16 %v1831_v9, %v1830_v38 }
 0x1c5   :  { %v1850_v34 = vpack.c.bf16 %v1829_v42, %v1828_v47  ;;  %v2965_v41 = vpop.f32.mrb[104].mxu0  ;;  %v3066_v32 = vpop.f32.mrb[104].mxu1 }
 0x1c6   :  { %v1786_v40 = vadd.f32 %v3066_v32, %v1625_v57  ;;  %v2966_v46 = vpop.f32.mrb[105].mxu0  ;;  %v1777_v52 = vpop.f32.mrb[105].mxu1 }
 0x1c7   :  { %v2967_v43 = vadd.f32 %v2966_v46, %v2965_v41  ;;  %v1778_v54 = vadd.f32 %v1777_v52, %v1617_v26  ;;  %v2968_v0 = vpop.f32.mrb[106].mxu0  ;;  %v3067_v36 = vpop.f32.mrb[106].mxu1  ;;  %3108 = vmatprep.mubr.bf16.mxu1 %v1850_v34 }
 0x1c8   :  { %v1789_v61 = vadd.f32 %v3067_v36, %v1628_v44  ;;  %v2969_v1 = vpop.f32.mrb[107].mxu0  ;;  %v1780_v56 = vpop.f32.mrb[107].mxu1  ;;  %3109 = vmatmul.mubr.bf16.gmra.mrb[132].mxu1 %v1851_v33  ;;  %v1834_v12 = vmax.f32 %v1786_v40, 0.0 }
 0x1c9   :  { %v2970_v14 = vadd.f32 %v2969_v1, %v2968_v0  ;;  %v1781_v39 = vadd.f32 %v1780_v56, %v1620_v28  ;;  %v1633_v10 = vadd.f32 %v2967_v43, %v4211_v49  ;;  %v1832_v13 = vmax.f32 %v1778_v54, 0.0 }
 0x1ca   :  { %v1835_v27 = vmax.f32 %v1789_v61, 0.0 }
 0x1cb   :  { %v1833_v15 = vmax.f32 %v1781_v39, 0.0  ;;  %v1636_v17 = vadd.f32 %v2970_v14, %v4216_v8 }
 0x1cc   :  { %v1853_v2 = vpack.c.bf16 %v1835_v27, %v1834_v12 }
 0x1cd   :  { %v1852_v22 = vpack.c.bf16 %v1833_v15, %v1832_v13  ;;  %v2971_v24 = vpop.f32.mrb[108].mxu0  ;;  %v3070_v21 = vpop.f32.mrb[108].mxu1 }
 0x1ce   :  { %v2972_v4 = vpop.f32.mrb[109].mxu0  ;;  %v1793_v3 = vpop.f32.mrb[109].mxu1 }
 0x1cf   :  { %v2973_v60 = vadd.f32 %v2972_v4, %v2971_v24  ;;  %v1794_v5 = vadd.f32 %v1793_v3, %v1633_v10  ;;  %v2974_v58 = vpop.f32.mrb[110].mxu0  ;;  %v3071_v20 = vpop.f32.mrb[110].mxu1  ;;  %3112 = vmatprep.mubr.bf16.mxu1 %v1852_v22 }
 0x1d0   :  { %v2975_v26 = vpop.f32.mrb[111].mxu0  ;;  %v1796_v31 = vpop.f32.mrb[111].mxu1  ;;  %3113 = vmatmul.mubr.bf16.gmra.mrb[136].mxu1 %v1853_v2 }
 0x1d1   :  { %v1641_v49 = vadd.f32 %v2973_v60, %v4225_v62  ;;  %v2976_v30 = vadd.f32 %v2975_v26, %v2974_v58  ;;  %v1797_v45 = vadd.f32 %v1796_v31, %v1636_v17  ;;  %v1836_v8 = vmax.f32 %v1794_v5, 0.0 }
 0x1d3   :  { %v1802_v53 = vadd.f32 %v3070_v21, %v1641_v49  ;;  %v1644_v28 = vadd.f32 %v2976_v30, %v4230_v16  ;;  %v1837_v18 = vmax.f32 %v1797_v45, 0.0 }
 0x1d5   :  { %v1805_v11 = vadd.f32 %v3071_v20, %v1644_v28  ;;  %v1854_v59 = vpack.c.bf16 %v1837_v18, %v1836_v8  ;;  %v1838_v35 = vmax.f32 %v1802_v53, 0.0 }
 0x1d7   :  { %v1839_v25 = vmax.f32 %v1805_v11, 0.0  ;;  %3116 = vmatprep.mubr.bf16.mxu1 %v1854_v59 }
 0x1d9   :  { %v1855_v23 = vpack.c.bf16 %v1839_v25, %v1838_v35 }
 0x1db   :  { %3117 = vmatmul.mubr.bf16.gmra.mrb[140].mxu1 %v1855_v23 }
 0x273   :  { %v3090_v62 = vpop.f32.mrb[112].mxu1 }
 0x274   :  { %v1970_v7 = vadd.f32 %v3090_v62, %v4279_v19  ;;  %v1961_v63 = vpop.f32.mrb[113].mxu1 }
 0x275   :  { %v1962_v48 = vadd.f32 %v4279_v19, %v1961_v63  ;;  %v3091_v16 = vpop.f32.mrb[114].mxu1 }
 0x276   :  { %v1973_v51 = vadd.f32 %v3091_v16, %v4279_v19  ;;  %v1964_v50 = vpop.f32.mrb[115].mxu1  ;;  %v2090_v37 = vmax.f32 %v1970_v7, 0.0 }
 0x277   :  { %v1965_v29 = vadd.f32 %v4279_v19, %v1964_v50  ;;  %v2088_v55 = vmax.f32 %v1962_v48, 0.0 }
 0x278   :  { %v2091_v6 = vmax.f32 %v1973_v51, 0.0 }
 0x279   :  { %v2089_v57 = vmax.f32 %v1965_v29, 0.0 }
 0x27a   :  { %v2121_v38 = vpack.c.bf16 %v2091_v6, %v2090_v37 }
 0x27b   :  { %v2120_v9 = vpack.c.bf16 %v2089_v57, %v2088_v55  ;;  %v3094_v47 = vpop.f32.mrb[116].mxu1 }
 0x27c   :  { %v1986_v42 = vadd.f32 %v3094_v47, %v4279_v19  ;;  %v1977_v44 = vpop.f32.mrb[117].mxu1 }
 0x27d   :  { %v1978_v33 = vadd.f32 %v4279_v19, %v1977_v44  ;;  %v3095_v34 = vpop.f32.mrb[118].mxu1  ;;  %3128 = vmatprep.mubr.msk.bf16.mxu0 %vm2175_vm1, %v2120_v9 }
 0x27e   :  { %v1989_v41 = vadd.f32 %v3095_v34, %v4279_v19  ;;  %v1980_v32 = vpop.f32.mrb[119].mxu1  ;;  %3129 = vmatmul.mubr.msk.bf16.vlgmr.msra.gmra.mrb[112].mxu0 %vm2175_vm1, %v2121_v38  ;;  %v2094_v46 = vmax.f32 %v1986_v42, 0.0 }
 0x27f   :  { %v1981_v40 = vadd.f32 %v4279_v19, %v1980_v32  ;;  %v2092_v43 = vmax.f32 %v1978_v33, 0.0 }
 0x280   :  { %v2095_v52 = vmax.f32 %v1989_v41, 0.0 }
 0x281   :  { %v2093_v54 = vmax.f32 %v1981_v40, 0.0 }
 0x282   :  { %v2123_v0 = vpack.c.bf16 %v2095_v52, %v2094_v46 }
 0x283   :  { %v2122_v36 = vpack.c.bf16 %v2093_v54, %v2092_v43  ;;  %v3098_v61 = vpop.f32.mrb[120].mxu1 }
 0x284   :  { %v2002_v1 = vadd.f32 %v3098_v61, %v4279_v19  ;;  %v1993_v56 = vpop.f32.mrb[121].mxu1 }
 0x285   :  { %v1994_v14 = vadd.f32 %v4279_v19, %v1993_v56  ;;  %v3099_v39 = vpop.f32.mrb[122].mxu1  ;;  %3132 = vmatprep.mubr.msk.bf16.mxu0 %vm2175_vm1, %v2122_v36 }
 0x286   :  { %v2005_v10 = vadd.f32 %v3099_v39, %v4279_v19  ;;  %v1996_v12 = vpop.f32.mrb[123].mxu1  ;;  %3133 = vmatmul.mubr.msk.bf16.gmra.mrb[116].mxu0 %vm2175_vm1, %v2123_v0  ;;  %v2098_v13 = vmax.f32 %v2002_v1, 0.0 }
 0x287   :  { %v1997_v27 = vadd.f32 %v4279_v19, %v1996_v12  ;;  %v2096_v17 = vmax.f32 %v1994_v14, 0.0 }
 0x288   :  { %v2099_v15 = vmax.f32 %v2005_v10, 0.0 }
 0x289   :  { %v2097_v2 = vmax.f32 %v1997_v27, 0.0 }
 0x28a   :  { %v2125_v22 = vpack.c.bf16 %v2099_v15, %v2098_v13 }
 0x28b   :  { %v2124_v24 = vpack.c.bf16 %v2097_v2, %v2096_v17  ;;  %v3102_v21 = vpop.f32.mrb[124].mxu1 }
 0x28c   :  { %v2018_v4 = vadd.f32 %v3102_v21, %v4279_v19  ;;  %v2009_v3 = vpop.f32.mrb[125].mxu1 }
 0x28d   :  { %v2010_v60 = vadd.f32 %v4279_v19, %v2009_v3  ;;  %v3103_v5 = vpop.f32.mrb[126].mxu1  ;;  %3136 = vmatprep.mubr.msk.bf16.mxu0 %vm2175_vm1, %v2124_v24 }
 0x28e   :  { %v2021_v58 = vadd.f32 %v3103_v5, %v4279_v19  ;;  %v2012_v20 = vpop.f32.mrb[127].mxu1  ;;  %3137 = vmatmul.mubr.msk.bf16.gmra.mrb[120].mxu0 %vm2175_vm1, %v2125_v22  ;;  %v2102_v31 = vmax.f32 %v2018_v4, 0.0 }
 0x28f   :  { %v2013_v26 = vadd.f32 %v4279_v19, %v2012_v20  ;;  %v2100_v30 = vmax.f32 %v2010_v60, 0.0 }
 0x290   :  { %v2103_v49 = vmax.f32 %v2021_v58, 0.0 }
 0x291   :  { %v2101_v45 = vmax.f32 %v2013_v26, 0.0  ;;  %v4332_v26 = vld [vmem:[%s4384_s6] ss:$0 sm:$0xff]  ;;  %s3424_s6 = smov [#allocation2]  }
 0x292   :  { %v2127_v53 = vpack.c.bf16 %v2103_v49, %v2102_v31  ;;  %s2422_s18 = sshll.u32 %s3424_s6, 4  ;;  %s2423_s18 = int_to_ptr.vmem [resolvable:$true] %s2422_s18 }
 0x293   :  { %v2126_v8 = vpack.c.bf16 %v2101_v45, %v2100_v30  ;;  %v3106_v28 = vpop.f32.mrb[128].mxu1  ;;  %s3400_s19 = scalar_lea.vmem %s2423_s18, 4096  ;;  %p3405_p1 = scmp.lt.s32.totalorder %s2423_s18, %s2423_s18 }
 0x294   :  { %v2034_v18 = vadd.f32 %v3106_v28, %v4279_v19  ;;  %v2025_v11 = vpop.f32.mrb[129].mxu1  ;;  %p3401_p0 = scmp.ne.s32.totalorder %s2423_s18, %s3400_s19  ;;  %p3406_p2 = scmp.lt.s32.totalorder %s3400_s19, %s3400_s19 }
 0x295   :  { %v2026_v59 = vadd.f32 %v4279_v19, %v2025_v11  ;;  %v3107_v35 = vpop.f32.mrb[130].mxu1  ;;  %3140 = vmatprep.mubr.msk.bf16.mxu0 %vm2175_vm1, %v2126_v8 }
 0x296   :  { %v2037_v25 = vadd.f32 %v3107_v35, %v4279_v19  ;;  %v2028_v23 = vpop.f32.mrb[131].mxu1  ;;  %3141 = vmatmul.mubr.msk.bf16.gmra.mrb[124].mxu0 %vm2175_vm1, %v2127_v53  ;;  %v2106_v7 = vmax.f32 %v2034_v18, 0.0  ;;  %p3407_p3 = por %p3406_p2, %p3405_p1 }
 0x297   :  { %v2029_v62 = vadd.f32 %v4279_v19, %v2028_v23  ;;  %v2104_v48 = vmax.f32 %v2026_v59, 0.0 }
 0x298   :  { %v2107_v63 = vmax.f32 %v2037_v25, 0.0  ;;  %p3408_p4 = pnand %p3407_p3, %p3401_p0 }
 0x299   :  { %v2105_v16 = vmax.f32 %v2029_v62, 0.0 }
 0x29a   :  { %v2129_v51 = vpack.c.bf16 %v2107_v63, %v2106_v7 }
 0x29b   :  { %v2128_v50 = vpack.c.bf16 %v2105_v16, %v2104_v48  ;;  %v3110_v29 = vpop.f32.mrb[132].mxu1 }
 0x29c   :  { %v2050_v37 = vadd.f32 %v3110_v29, %v4279_v19  ;;  %v2041_v6 = vpop.f32.mrb[133].mxu1 }
 0x29d   :  { %v2042_v55 = vadd.f32 %v4279_v19, %v2041_v6  ;;  %v3111_v57 = vpop.f32.mrb[134].mxu1  ;;  %3144 = vmatprep.mubr.msk.bf16.mxu0 %vm2175_vm1, %v2128_v50 }
 0x29e   :  { %v2053_v38 = vadd.f32 %v3111_v57, %v4279_v19  ;;  %v2044_v9 = vpop.f32.mrb[135].mxu1  ;;  %3145 = vmatmul.mubr.msk.bf16.gmra.mrb[128].mxu0 %vm2175_vm1, %v2129_v51  ;;  %v2110_v42 = vmax.f32 %v2050_v37, 0.0 }
 0x29f   :  { %v2045_v47 = vadd.f32 %v4279_v19, %v2044_v9  ;;  %v2108_v33 = vmax.f32 %v2042_v55, 0.0 }
 0x2a0   :  { %v2111_v44 = vmax.f32 %v2053_v38, 0.0 }
 0x2a1   :  { %v2109_v34 = vmax.f32 %v2045_v47, 0.0 }
 0x2a2   :  { %v2131_v41 = vpack.c.bf16 %v2111_v44, %v2110_v42 }
 0x2a3   :  { %v2130_v32 = vpack.c.bf16 %v2109_v34, %v2108_v33  ;;  %v3114_v40 = vpop.f32.mrb[136].mxu1 }
 0x2a4   :  { %v2066_v46 = vadd.f32 %v3114_v40, %v4279_v19  ;;  %v2057_v52 = vpop.f32.mrb[137].mxu1 }
 0x2a5   :  { %v2058_v43 = vadd.f32 %v4279_v19, %v2057_v52  ;;  %v3115_v54 = vpop.f32.mrb[138].mxu1  ;;  %3148 = vmatprep.mubr.msk.bf16.mxu0 %vm2175_vm1, %v2130_v32 }
 0x2a6   :  { %v2069_v0 = vadd.f32 %v3115_v54, %v4279_v19  ;;  %v2060_v36 = vpop.f32.mrb[139].mxu1  ;;  %3149 = vmatmul.mubr.msk.bf16.gmra.mrb[132].mxu0 %vm2175_vm1, %v2131_v41  ;;  %v2114_v1 = vmax.f32 %v2066_v46, 0.0 }
 0x2a7   :  { %v2061_v61 = vadd.f32 %v4279_v19, %v2060_v36  ;;  %v2112_v14 = vmax.f32 %v2058_v43, 0.0 }
 0x2a8   :  { %v2115_v56 = vmax.f32 %v2069_v0, 0.0 }
 0x2a9   :  { %v2113_v39 = vmax.f32 %v2061_v61, 0.0 }
 0x2aa   :  { %v2133_v10 = vpack.c.bf16 %v2115_v56, %v2114_v1 }
 0x2ab   :  { %v2132_v12 = vpack.c.bf16 %v2113_v39, %v2112_v14 }
 0x2ad   :  { %3152 = vmatprep.mubr.msk.bf16.mxu0 %vm2175_vm1, %v2132_v12 }
 0x2ae   :  { %v3118_v27 = vpop.f32.mrb[140].mxu1  ;;  %3153 = vmatmul.mubr.msk.bf16.gmra.mrb[136].mxu0 %vm2175_vm1, %v2133_v10 }
 0x2af   :  { %v2082_v13 = vadd.f32 %v3118_v27, %v4279_v19  ;;  %v2073_v15 = vpop.f32.mrb[141].mxu1 }
 0x2b0   :  { %v2074_v17 = vadd.f32 %v4279_v19, %v2073_v15  ;;  %v3119_v2 = vpop.f32.mrb[142].mxu1 }
 0x2b1   :  { %v2085_v22 = vadd.f32 %v3119_v2, %v4279_v19  ;;  %v2076_v24 = vpop.f32.mrb[143].mxu1  ;;  %v2118_v4 = vmax.f32 %v2082_v13, 0.0 }
 0x2b2   :  { %v2077_v21 = vadd.f32 %v4279_v19, %v2076_v24  ;;  %v2116_v60 = vmax.f32 %v2074_v17, 0.0 }
 0x2b3   :  { %v2119_v3 = vmax.f32 %v2085_v22, 0.0 }
 0x2b4   :  { %v2117_v5 = vmax.f32 %v2077_v21, 0.0 }
 0x2b5   :  { %v2135_v58 = vpack.c.bf16 %v2119_v3, %v2118_v4 }
 0x2b6   :  { %v2134_v20 = vpack.c.bf16 %v2117_v5, %v2116_v60 }
 0x2b8   :  { %3156 = vmatprep.mubr.msk.bf16.mxu0 %vm2175_vm1, %v2134_v20 }
 0x2b9   :  { %3157 = vmatmul.mubr.msk.bf16.gmra.mrb[140].mxu0 %vm2175_vm1, %v2135_v58 }
 0x351   :  { %v3130_v31 = vpop.f32.mrb[112].mxu0 }
 0x352   :  { %v2267_v49 = vadd.f32 %v3130_v31, %v4332_v26  ;;  %v2258_v30 = vpop.f32.mrb[113].mxu0 }
 0x353   :  { %v2259_v19 = vadd.f32 %v4332_v26, %v2258_v30  ;;  %v3131_v45 = vpop.f32.mrb[114].mxu0 }
 0x354   :  { %2387 = vst [vmem:[#allocation2 + $0x10] sm:$0xff] %v2267_v49  ;;  %v2270_v53 = vadd.f32 %v3131_v45, %v4332_v26  ;;  %v2261_v8 = vpop.f32.mrb[115].mxu0 }
 0x355   :  { %2385 = vst [vmem:[#allocation2] sm:$0xff] %v2259_v19  ;;  %v2262_v28 = vadd.f32 %v4332_v26, %v2261_v8 }
 0x356   :  { %2388 = vst [vmem:[#allocation2 + $0x18] sm:$0xff] %v2270_v53 }
 0x357   :  { %2386 = vst [vmem:[#allocation2 + $0x8] sm:$0xff] %v2262_v28 }
 0x359   :  { %v3134_v18 = vpop.f32.mrb[116].mxu0 }
 0x35a   :  { %v2283_v11 = vadd.f32 %v3134_v18, %v4332_v26  ;;  %v2274_v59 = vpop.f32.mrb[117].mxu0 }
 0x35b   :  { %v2275_v35 = vadd.f32 %v4332_v26, %v2274_v59  ;;  %v3135_v25 = vpop.f32.mrb[118].mxu0 }
 0x35c   :  { %2391 = vst [vmem:[#allocation2 + $0x30] sm:$0xff] %v2283_v11  ;;  %v2286_v23 = vadd.f32 %v3135_v25, %v4332_v26  ;;  %v2277_v62 = vpop.f32.mrb[119].mxu0 }
 0x35d   :  { %2389 = vst [vmem:[#allocation2 + $0x20] sm:$0xff] %v2275_v35  ;;  %v2278_v7 = vadd.f32 %v4332_v26, %v2277_v62 }
 0x35e   :  { %2392 = vst [vmem:[#allocation2 + $0x38] sm:$0xff] %v2286_v23 }
 0x35f   :  { %2390 = vst [vmem:[#allocation2 + $0x28] sm:$0xff] %v2278_v7 }
 0x361   :  { %v3138_v63 = vpop.f32.mrb[120].mxu0 }
 0x362   :  { %v2299_v48 = vadd.f32 %v3138_v63, %v4332_v26  ;;  %v2290_v16 = vpop.f32.mrb[121].mxu0 }
 0x363   :  { %v2291_v51 = vadd.f32 %v4332_v26, %v2290_v16  ;;  %v3139_v50 = vpop.f32.mrb[122].mxu0 }
 0x364   :  { %2395 = vst [vmem:[#allocation2 + $0x50] sm:$0xff] %v2299_v48  ;;  %v2302_v29 = vadd.f32 %v3139_v50, %v4332_v26  ;;  %v2293_v37 = vpop.f32.mrb[123].mxu0 }
 0x365   :  { %2393 = vst [vmem:[#allocation2 + $0x40] sm:$0xff] %v2291_v51  ;;  %v2294_v6 = vadd.f32 %v4332_v26, %v2293_v37 }
 0x366   :  { %2396 = vst [vmem:[#allocation2 + $0x58] sm:$0xff] %v2302_v29 }
 0x367   :  { %2394 = vst [vmem:[#allocation2 + $0x48] sm:$0xff] %v2294_v6 }
 0x369   :  { %v3142_v55 = vpop.f32.mrb[124].mxu0 }
 0x36a   :  { %v2315_v57 = vadd.f32 %v3142_v55, %v4332_v26  ;;  %v2306_v38 = vpop.f32.mrb[125].mxu0 }
 0x36b   :  { %v2307_v9 = vadd.f32 %v4332_v26, %v2306_v38  ;;  %v3143_v47 = vpop.f32.mrb[126].mxu0 }
 0x36c   :  { %2399 = vst [vmem:[#allocation2 + $0x70] sm:$0xff] %v2315_v57  ;;  %v2318_v42 = vadd.f32 %v3143_v47, %v4332_v26  ;;  %v2309_v44 = vpop.f32.mrb[127].mxu0 }
 0x36d   :  { %2397 = vst [vmem:[#allocation2 + $0x60] sm:$0xff] %v2307_v9  ;;  %v2310_v33 = vadd.f32 %v4332_v26, %v2309_v44 }
 0x36e   :  { %2400 = vst [vmem:[#allocation2 + $0x78] sm:$0xff] %v2318_v42 }
 0x36f   :  { %2398 = vst [vmem:[#allocation2 + $0x68] sm:$0xff] %v2310_v33 }
 0x371   :  { %v3146_v34 = vpop.f32.mrb[128].mxu0 }
 0x372   :  { %v2331_v41 = vadd.f32 %v3146_v34, %v4332_v26  ;;  %v2322_v32 = vpop.f32.mrb[129].mxu0 }
 0x373   :  { %v2323_v40 = vadd.f32 %v4332_v26, %v2322_v32  ;;  %v3147_v46 = vpop.f32.mrb[130].mxu0 }
 0x374   :  { %2403 = vst [vmem:[#allocation2 + $0x90] sm:$0xff] %v2331_v41  ;;  %v2334_v52 = vadd.f32 %v3147_v46, %v4332_v26  ;;  %v2325_v43 = vpop.f32.mrb[131].mxu0 }
 0x375   :  { %2401 = vst [vmem:[#allocation2 + $0x80] sm:$0xff] %v2323_v40  ;;  %v2326_v54 = vadd.f32 %v4332_v26, %v2325_v43 }
 0x376   :  { %2404 = vst [vmem:[#allocation2 + $0x98] sm:$0xff] %v2334_v52 }
 0x377   :  { %2402 = vst [vmem:[#allocation2 + $0x88] sm:$0xff] %v2326_v54 }
 0x379   :  { %v3150_v0 = vpop.f32.mrb[132].mxu0 }
 0x37a   :  { %v2347_v36 = vadd.f32 %v3150_v0, %v4332_v26  ;;  %v2338_v61 = vpop.f32.mrb[133].mxu0 }
 0x37b   :  { %v2339_v1 = vadd.f32 %v4332_v26, %v2338_v61  ;;  %v3151_v56 = vpop.f32.mrb[134].mxu0 }
 0x37c   :  { %2407 = vst [vmem:[#allocation2 + $0xb0] sm:$0xff] %v2347_v36  ;;  %v2350_v14 = vadd.f32 %v3151_v56, %v4332_v26  ;;  %v2341_v39 = vpop.f32.mrb[135].mxu0 }
 0x37d   :  { %2405 = vst [vmem:[#allocation2 + $0xa0] sm:$0xff] %v2339_v1  ;;  %v2342_v10 = vadd.f32 %v4332_v26, %v2341_v39 }
 0x37e   :  { %2408 = vst [vmem:[#allocation2 + $0xb8] sm:$0xff] %v2350_v14 }
 0x37f   :  { %2406 = vst [vmem:[#allocation2 + $0xa8] sm:$0xff] %v2342_v10 }
 0x381   :  { %v3154_v12 = vpop.f32.mrb[136].mxu0 }
 0x382   :  { %v2363_v27 = vadd.f32 %v3154_v12, %v4332_v26  ;;  %v2354_v13 = vpop.f32.mrb[137].mxu0 }
 0x383   :  { %v2355_v15 = vadd.f32 %v4332_v26, %v2354_v13  ;;  %v3155_v17 = vpop.f32.mrb[138].mxu0 }
 0x384   :  { %2411 = vst [vmem:[#allocation2 + $0xd0] sm:$0xff] %v2363_v27  ;;  %v2366_v2 = vadd.f32 %v3155_v17, %v4332_v26  ;;  %v2357_v22 = vpop.f32.mrb[139].mxu0 }
 0x385   :  { %2409 = vst [vmem:[#allocation2 + $0xc0] sm:$0xff] %v2355_v15  ;;  %v2358_v24 = vadd.f32 %v4332_v26, %v2357_v22 }
 0x386   :  { %2412 = vst [vmem:[#allocation2 + $0xd8] sm:$0xff] %v2366_v2 }
 0x387   :  { %2410 = vst [vmem:[#allocation2 + $0xc8] sm:$0xff] %v2358_v24 }
 0x38c   :  { %v3158_v21 = vpop.f32.mrb[140].mxu0 }
 0x38d   :  { %v2379_v4 = vadd.f32 %v3158_v21, %v4332_v26  ;;  %v2370_v3 = vpop.f32.mrb[141].mxu0 }
 0x38e   :  { %v2371_v60 = vadd.f32 %v4332_v26, %v2370_v3  ;;  %v3159_v5 = vpop.f32.mrb[142].mxu0 }
 0x38f   :  { %2415 = vst [vmem:[#allocation2 + $0xf0] sm:$0xff] %v2379_v4  ;;  %v2382_v58 = vadd.f32 %v3159_v5, %v4332_v26  ;;  %v2373_v20 = vpop.f32.mrb[143].mxu0 }
 0x390   :  { %2413 = vst [vmem:[#allocation2 + $0xe0] sm:$0xff] %v2371_v60  ;;  %v2374_v31 = vadd.f32 %v4332_v26, %v2373_v20 }
 0x391   :  { %2416 = vst [vmem:[#allocation2 + $0xf8] sm:$0xff] %v2382_v58 }
 0x392   :  { %2414 = vst [vmem:[#allocation2 + $0xe8] sm:$0xff] %v2374_v31 }
 0x393   :  { %3411 = shalt.err (!%p3408_p4)
}
 0x394   :  { %s3412_s22 = scalar_lea.hbm %s4385_s7, 4096 }
 0x395   :  { %p3413_p5 = scmp.ne.s32.totalorder %s4385_s7, %s3412_s22  ;;  %p3416_p6 = scmp.lt.u32.totalorder %s3412_s22, %s4385_s7 }
 0x397   :  { %p3418_p7 = pnand %p3416_p6, %p3413_p5 }
 0x399   :  { %3421 = shalt.err (!%p3418_p7)
}
 0x39a   :  { %s3425_s1 = smov 128   ;;  %s3426_s26 = smov 8  }
 0x39b   :  { %2428 = dma.vmem_to_hbm [thread:$0]  %s2423_s18, 4096, %s4385_s7, [#allocation3], %s3425_s1, %s3425_s1, %s3426_s26  }
 0x39c   :  { %3422 = dma.done.wait [#allocation3], 4096  }
 0x39d   :  { %3423 = vsyncadd [#allocation3], 4294963200 }
 0x39e   :  { %2432 = vsyncpa [#allocation3], 1 }

</bundles_post_ra>
